<compile_context>
chip_gen: v7x
topology: tpu7x:2x2x1
jax: 0.10.0
libtpu: 0.0.40
codegen_flags: <defaults>
</compile_context>

<pallas_src>
import jax
import jax.numpy as jnp
from jax.experimental import pallas as pl
from jax.experimental.pallas import tpu as pltpu

# logical dims
D_IN, H, LZ = 784, 400, 20
# lane-padded dims (multiples of 128)
D_IN_P, H_P, LZ_P = 896, 512, 128


def _round_up(x, m):
    return ((x + m - 1) // m) * m


def _pick_tb(B):
    """Batch tile: single tile for tiny batches; otherwise >=2 grid steps (v7x dual-TC), <=512 rows."""
    if B <= 16:
        return _round_up(max(B, 8), 8)          # block == full (padded) array
    return min(512, _round_up((B + 1) // 2, 16))  # 16-multiple keeps bf16 sublane tiles clean


def _vae_kernel(x_ref, w1_ref, b1_ref, wmlv_ref, bmlv_ref,
                w3_ref, b3_ref, w4_ref, b4_ref, eps_ref,
                recon_ref, mulv_ref):
    # ---- encode: h1 = relu(x @ W1 + b1)   (bf16 x bf16 -> f32 accumulation) ----
    h1 = jnp.dot(x_ref[...], w1_ref[...],
                 preferred_element_type=jnp.float32) + b1_ref[...]          # [TB, 512] f32
    h1 = jnp.maximum(h1, 0.0)

    # ---- fused mu/logvar: one lane-dense [512,256] bf16 matmul, two 128-lane slabs ----
    mulv = jnp.dot(h1.astype(jnp.bfloat16), wmlv_ref[...],
                   preferred_element_type=jnp.float32) + bmlv_ref[...]      # [TB, 256] f32
    mu = mulv[:, :LZ_P]                                                     # lanes   0:128
    logvar = mulv[:, LZ_P:]                                                 # lanes 128:256

    # ---- reparametrize on the full 128-lane slab (padded lanes of mu/logvar/eps are 0) ----
    std = jnp.exp(0.5 * logvar)                                             # padded lanes -> 1
    z = eps_ref[...].astype(jnp.float32) * std + mu                         # padded lanes -> 0

    # ---- decode: h3 = relu(z @ W3 + b3); recon = sigmoid(h3 @ W4 + b4) ----
    h3 = jnp.dot(z.astype(jnp.bfloat16), w3_ref[...],
                 preferred_element_type=jnp.float32) + b3_ref[...]          # [TB, 512] f32
    h3 = jnp.maximum(h3, 0.0)
    logits = jnp.dot(h3.astype(jnp.bfloat16), w4_ref[...],
                     preferred_element_type=jnp.float32) + b4_ref[...]      # [TB, 896] f32
    recon_ref[...] = jax.nn.sigmoid(logits).astype(recon_ref.dtype)         # f32 sigmoid, bf16 store
    mulv_ref[...] = mulv                                                    # lane-dense [TB, 256] f32


def pack_params(params):
    """One-time layout packing: pad to lane multiples, fuse fc21/fc22 into aligned slabs, cast to bf16."""
    (w1, b1), (w21, b21), (w22, b22), (w3, b3), (w4, b4) = params

    def pad2(a, rows, cols):
        return jnp.pad(a, ((0, rows - a.shape[0]), (0, cols - a.shape[1])))

    w1p = pad2(w1, D_IN_P, H_P).astype(jnp.bfloat16)              # [896, 512] bf16
    b1p = pad2(b1, 1, H_P)                                        # [1, 512]   f32

    # mu slab in lanes 0:128, logvar slab in lanes 128:256 (each 128-lane aligned)
    wmlvp = jnp.concatenate([pad2(w21, H_P, LZ_P),
                             pad2(w22, H_P, LZ_P)], axis=1).astype(jnp.bfloat16)   # [512, 256] bf16
    bmlvp = jnp.concatenate([pad2(b21, 1, LZ_P),
                             pad2(b22, 1, LZ_P)], axis=1)                          # [1, 256]   f32

    w3p = pad2(w3, LZ_P, H_P).astype(jnp.bfloat16)                # [128, 512] bf16 (rows 20: are 0)
    b3p = pad2(b3, 1, H_P)                                        # [1, 512]   f32

    w4p = pad2(w4, H_P, D_IN_P).astype(jnp.bfloat16)              # [512, 896] bf16
    b4p = pad2(b4, 1, D_IN_P)                                     # [1, 896]   f32

    return (w1p, b1p, wmlvp, bmlvp, w3p, b3p, w4p, b4p)


@jax.jit
def vae_forward(x, packed, eps):
    """x: [B,784] f32, eps: [B,20] f32 -> (recon [B,784] f32, mu [B,20] f32, logvar [B,20] f32)."""
    B = x.shape[0]
    w1p, b1p, wmlvp, bmlvp, w3p, b3p, w4p, b4p = packed

    TB = _pick_tb(B)
    Bp = _round_up(B, TB)

    # pad + bf16 cast fused in the wrapper: halves x/eps HBM traffic into the kernel
    x_pad = jnp.pad(x.astype(jnp.bfloat16), ((0, Bp - B), (0, D_IN_P - D_IN)))
    eps_pad = jnp.pad(eps.astype(jnp.bfloat16), ((0, Bp - B), (0, LZ_P - LZ)))

    def batch_spec(cols):
        return pl.BlockSpec((TB, cols), lambda i: (i, 0))

    def const_spec(shape):
        # Weights/biases: constant block index -> loaded once, VMEM-resident across the grid.
        return pl.BlockSpec(shape, lambda i: (0, 0))

    recon_pad, mulv = pl.pallas_call(
        _vae_kernel,
        out_shape=(jax.ShapeDtypeStruct((Bp, D_IN_P), jnp.bfloat16),   # recon written back bf16
                   jax.ShapeDtypeStruct((Bp, 2 * LZ_P), jnp.float32)), # mu|logvar slabs, f32
        grid=(Bp // TB,),
        in_specs=[batch_spec(D_IN_P),                               # x (bf16)
                  const_spec(w1p.shape), const_spec(b1p.shape),     # fc1
                  const_spec(wmlvp.shape), const_spec(bmlvp.shape), # fused fc21+fc22
                  const_spec(w3p.shape), const_spec(b3p.shape),     # fc3
                  const_spec(w4p.shape), const_spec(b4p.shape),     # fc4
                  batch_spec(LZ_P)],                                # eps (bf16)
        out_specs=(batch_spec(D_IN_P), batch_spec(2 * LZ_P)),
        compiler_params=pltpu.CompilerParams(dimension_semantics=("parallel",)),
    )(x_pad, w1p, b1p, wmlvp, bmlvp, w3p, b3p, w4p, b4p, eps_pad)

    # single fused slice + f32 cast (reads the half-size bf16 buffer)
    recon = recon_pad[:B, :D_IN].astype(jnp.float32)
    mu = mulv[:B, :LZ]
    logvar = mulv[:B, LZ_P:LZ_P + LZ]
    return recon, mu, logvar


def init_params(key):
    """nn.Linear-style init: U(-1/sqrt(fan_in), 1/sqrt(fan_in)); weights stored [in, out]."""
    dims = [(D_IN, H), (H, LZ), (H, LZ), (LZ, H), (H, D_IN)]
    params = []
    for (fan_in, fan_out) in dims:
        key, kw, kb = jax.random.split(key, 3)
        bound = 1.0 / jnp.sqrt(jnp.float32(fan_in))
        w = jax.random.uniform(kw, (fan_in, fan_out), jnp.float32, -bound, bound)
        b = jax.random.uniform(kb, (1, fan_out), jnp.float32, -bound, bound)
        params.append((w, b))
    return params


def ref_forward(x, params, eps):
    """Pure-JAX f32 reference of the PyTorch forward (for correctness check)."""
    (w1, b1), (w21, b21), (w22, b22), (w3, b3), (w4, b4) = params
    h1 = jax.nn.relu(x @ w1 + b1)
    mu = h1 @ w21 + b21
    logvar = h1 @ w22 + b22
    z = eps * jnp.exp(0.5 * logvar) + mu
    h3 = jax.nn.relu(z @ w3 + b3)
    return jax.nn.sigmoid(h3 @ w4 + b4), mu, logvar


if __name__ == "__main__":
    key = jax.random.PRNGKey(0)
    key, k_params, k_x, k_eps = jax.random.split(key, 4)

    B = 8  # small batch; 784 = 28*28 MNIST flattened as the module implies
    params = init_params(k_params)
    x = jax.random.normal(k_x, (B, D_IN), jnp.float32)
    # TODO(synk): the PyTorch module samples eps inside forward; here eps is an explicit input
    # so the kernel is deterministic and checkable (in-kernel pltpu.prng_* would also work).
    eps = jax.random.normal(k_eps, (B, LZ), jnp.float32)

    packed = pack_params(params)  # one-time padding / slab-fusion / bf16 cast (outside the jitted fwd)
    recon, mu, logvar = vae_forward(x, packed, eps)
    jax.block_until_ready((recon, mu, logvar))

    r_recon, r_mu, r_logvar = ref_forward(x, params, eps)
    assert recon.shape == (B, D_IN) and mu.shape == (B, LZ) and logvar.shape == (B, LZ)
    assert bool(jnp.all(jnp.isfinite(recon))) and bool(jnp.all((recon >= 0) & (recon <= 1)))
    assert float(jnp.max(jnp.abs(recon - r_recon))) < 3e-2   # bf16-weight/IO tolerance
    assert float(jnp.max(jnp.abs(mu - r_mu))) < 3e-2
    assert float(jnp.max(jnp.abs(logvar - r_logvar))) < 3e-2
    print("KERNEL_OK")
</pallas_src>

<mosaic_0001>
module attributes {stable_mosaic.version = 11 : i64} {
  func.func @_vae_kernel(%arg0: i32, %arg1: memref<8x896xbf16, #tpu.memory_space<vmem>>, %arg2: memref<896x512xbf16, #tpu.memory_space<vmem>>, %arg3: memref<1x512xf32, #tpu.memory_space<vmem>>, %arg4: memref<512x256xbf16, #tpu.memory_space<vmem>>, %arg5: memref<1x256xf32, #tpu.memory_space<vmem>>, %arg6: memref<128x512xbf16, #tpu.memory_space<vmem>>, %arg7: memref<1x512xf32, #tpu.memory_space<vmem>>, %arg8: memref<512x896xbf16, #tpu.memory_space<vmem>>, %arg9: memref<1x896xf32, #tpu.memory_space<vmem>>, %arg10: memref<8x128xbf16, #tpu.memory_space<vmem>>, %arg11: memref<8x896xbf16, #tpu.memory_space<vmem>>, %arg12: memref<8x256xf32, #tpu.memory_space<vmem>>) attributes {dimension_semantics = [#tpu.dimension_semantics<parallel>], iteration_bounds = array<i64: 1>, scalar_prefetch = 0 : i64, scratch_operands = 0 : i64, tpu.core_type = #tpu.core_type<tc>, window_params = [{transform_indices = @transform_0, window_bounds = array<i64: 8, 896>}, {pipeline_mode = #tpu.pipeline_mode<synchronous>, transform_indices = @transform_1, window_bounds = array<i64: 896, 512>}, {pipeline_mode = #tpu.pipeline_mode<synchronous>, transform_indices = @transform_2, window_bounds = array<i64: 1, 512>}, {pipeline_mode = #tpu.pipeline_mode<synchronous>, transform_indices = @transform_3, window_bounds = array<i64: 512, 256>}, {pipeline_mode = #tpu.pipeline_mode<synchronous>, transform_indices = @transform_4, window_bounds = array<i64: 1, 256>}, {pipeline_mode = #tpu.pipeline_mode<synchronous>, transform_indices = @transform_5, window_bounds = array<i64: 128, 512>}, {pipeline_mode = #tpu.pipeline_mode<synchronous>, transform_indices = @transform_6, window_bounds = array<i64: 1, 512>}, {pipeline_mode = #tpu.pipeline_mode<synchronous>, transform_indices = @transform_7, window_bounds = array<i64: 512, 896>}, {pipeline_mode = #tpu.pipeline_mode<synchronous>, transform_indices = @transform_8, window_bounds = array<i64: 1, 896>}, {transform_indices = @transform_9, window_bounds = array<i64: 8, 128>}, {transform_indices = @transform_10, window_bounds = array<i64: 8, 896>}, {transform_indices = @transform_11, window_bounds = array<i64: 8, 256>}]} {
    %c0 = arith.constant 0 : index
    %c0_0 = arith.constant 0 : index
    %0 = vector.load %arg1[%c0, %c0_0] : memref<8x896xbf16, #tpu.memory_space<vmem>>, vector<8x896xbf16>
    %c0_1 = arith.constant 0 : index
    %c0_2 = arith.constant 0 : index
    %1 = vector.load %arg2[%c0_1, %c0_2] : memref<896x512xbf16, #tpu.memory_space<vmem>>, vector<896x512xbf16>
    %cst = arith.constant dense<0.000000e+00> : vector<8x512xf32>
    %2 = tpu.matmul %0, %1, %cst {dimension_numbers = #tpu.dot_dimension_numbers<[1], [0], [0], [1], [0, 0, 1, 1], [], []>} : vector<8x896xbf16>, vector<896x512xbf16>, vector<8x512xf32> -> vector<8x512xf32>
    %c0_3 = arith.constant 0 : index
    %c0_4 = arith.constant 0 : index
    %3 = vector.load %arg3[%c0_3, %c0_4] : memref<1x512xf32, #tpu.memory_space<vmem>>, vector<1x512xf32>
    %4 = vector.broadcast %3 : vector<1x512xf32> to vector<8x512xf32>
    %5 = arith.addf %2, %4 : vector<8x512xf32>
    %cst_5 = arith.constant 0.000000e+00 : f32
    %6 = vector.broadcast %cst_5 : f32 to vector<8x512xf32>
    %7 = arith.maximumf %5, %6 : vector<8x512xf32>
    %8 = arith.truncf %7 : vector<8x512xf32> to vector<8x512xbf16>
    %c0_6 = arith.constant 0 : index
    %c0_7 = arith.constant 0 : index
    %9 = vector.load %arg4[%c0_6, %c0_7] : memref<512x256xbf16, #tpu.memory_space<vmem>>, vector<512x256xbf16>
    %cst_8 = arith.constant dense<0.000000e+00> : vector<8x256xf32>
    %10 = tpu.matmul %8, %9, %cst_8 {dimension_numbers = #tpu.dot_dimension_numbers<[1], [0], [0], [1], [0, 0, 1, 1], [], []>} : vector<8x512xbf16>, vector<512x256xbf16>, vector<8x256xf32> -> vector<8x256xf32>
    %c0_9 = arith.constant 0 : index
    %c0_10 = arith.constant 0 : index
    %11 = vector.load %arg5[%c0_9, %c0_10] : memref<1x256xf32, #tpu.memory_space<vmem>>, vector<1x256xf32>
    %12 = vector.broadcast %11 : vector<1x256xf32> to vector<8x256xf32>
    %13 = arith.addf %10, %12 : vector<8x256xf32>
    %14 = vector.extract_strided_slice %13 {offsets = [0, 0], sizes = [8, 128], strides = [1, 1]} : vector<8x256xf32> to vector<8x128xf32>
    %15 = vector.extract_strided_slice %13 {offsets = [0, 128], sizes = [8, 128], strides = [1, 1]} : vector<8x256xf32> to vector<8x128xf32>
    %cst_11 = arith.constant 5.000000e-01 : f32
    %16 = vector.broadcast %cst_11 : f32 to vector<8x128xf32>
    %17 = arith.mulf %16, %15 : vector<8x128xf32>
    %18 = math.exp %17 : vector<8x128xf32>
    %c0_12 = arith.constant 0 : index
    %c0_13 = arith.constant 0 : index
    %19 = vector.load %arg10[%c0_12, %c0_13] : memref<8x128xbf16, #tpu.memory_space<vmem>>, vector<8x128xbf16>
    %20 = arith.extf %19 : vector<8x128xbf16> to vector<8x128xf32>
    %21 = arith.mulf %20, %18 : vector<8x128xf32>
    %22 = arith.addf %21, %14 : vector<8x128xf32>
    %23 = arith.truncf %22 : vector<8x128xf32> to vector<8x128xbf16>
    %c0_14 = arith.constant 0 : index
    %c0_15 = arith.constant 0 : index
    %24 = vector.load %arg6[%c0_14, %c0_15] : memref<128x512xbf16, #tpu.memory_space<vmem>>, vector<128x512xbf16>
    %cst_16 = arith.constant dense<0.000000e+00> : vector<8x512xf32>
    %25 = tpu.matmul %23, %24, %cst_16 {dimension_numbers = #tpu.dot_dimension_numbers<[1], [0], [0], [1], [0, 0, 1, 1], [], []>} : vector<8x128xbf16>, vector<128x512xbf16>, vector<8x512xf32> -> vector<8x512xf32>
    %c0_17 = arith.constant 0 : index
    %c0_18 = arith.constant 0 : index
    %26 = vector.load %arg7[%c0_17, %c0_18] : memref<1x512xf32, #tpu.memory_space<vmem>>, vector<1x512xf32>
    %27 = vector.broadcast %26 : vector<1x512xf32> to vector<8x512xf32>
    %28 = arith.addf %25, %27 : vector<8x512xf32>
    %cst_19 = arith.constant 0.000000e+00 : f32
    %29 = vector.broadcast %cst_19 : f32 to vector<8x512xf32>
    %30 = arith.maximumf %28, %29 : vector<8x512xf32>
    %31 = arith.truncf %30 : vector<8x512xf32> to vector<8x512xbf16>
    %c0_20 = arith.constant 0 : index
    %c0_21 = arith.constant 0 : index
    %32 = vector.load %arg8[%c0_20, %c0_21] : memref<512x896xbf16, #tpu.memory_space<vmem>>, vector<512x896xbf16>
    %cst_22 = arith.constant dense<0.000000e+00> : vector<8x896xf32>
    %33 = tpu.matmul %31, %32, %cst_22 {dimension_numbers = #tpu.dot_dimension_numbers<[1], [0], [0], [1], [0, 0, 1, 1], [], []>} : vector<8x512xbf16>, vector<512x896xbf16>, vector<8x896xf32> -> vector<8x896xf32>
    %c0_23 = arith.constant 0 : index
    %c0_24 = arith.constant 0 : index
    %34 = vector.load %arg9[%c0_23, %c0_24] : memref<1x896xf32, #tpu.memory_space<vmem>>, vector<1x896xf32>
    %35 = vector.broadcast %34 : vector<1x896xf32> to vector<8x896xf32>
    %36 = arith.addf %33, %35 : vector<8x896xf32>
    %37 = arith.negf %36 : vector<8x896xf32>
    %38 = math.exp %37 : vector<8x896xf32>
    %cst_25 = arith.constant 1.000000e+00 : f32
    %39 = vector.broadcast %cst_25 : f32 to vector<8x896xf32>
    %40 = arith.addf %39, %38 : vector<8x896xf32>
    %41 = arith.divf %39, %40 : vector<8x896xf32>
    %42 = arith.truncf %41 : vector<8x896xf32> to vector<8x896xbf16>
    %c0_26 = arith.constant 0 : index
    %c0_27 = arith.constant 0 : index
    %43 = vector.load %arg11[%c0_26, %c0_27] : memref<8x896xbf16, #tpu.memory_space<vmem>>, vector<8x896xbf16>
    tpu.vector_store %arg11[%c0_26, %c0_27], %42 {strides = array<i32>} : memref<8x896xbf16, #tpu.memory_space<vmem>>, vector<8x896xbf16>,
    %c0_28 = arith.constant 0 : index
    %c0_29 = arith.constant 0 : index
    %44 = vector.load %arg12[%c0_28, %c0_29] : memref<8x256xf32, #tpu.memory_space<vmem>>, vector<8x256xf32>
    tpu.vector_store %arg12[%c0_28, %c0_29], %13 {strides = array<i32>} : memref<8x256xf32, #tpu.memory_space<vmem>>, vector<8x256xf32>,
    return
  }
  func.func @transform_0(%arg0: i32) -> (i32, i32) {
    %c0_i32 = arith.constant 0 : i32
    %c0_i32_0 = arith.constant 0 : i32
    return %arg0, %c0_i32 : i32, i32
  }
  func.func @transform_1(%arg0: i32) -> (i32, i32) {
    %c0_i32 = arith.constant 0 : i32
    %c0_i32_0 = arith.constant 0 : i32
    %c0_i32_1 = arith.constant 0 : i32
    return %c0_i32, %c0_i32_0 : i32, i32
  }
  func.func @transform_2(%arg0: i32) -> (i32, i32) {
    %c0_i32 = arith.constant 0 : i32
    %c0_i32_0 = arith.constant 0 : i32
    %c0_i32_1 = arith.constant 0 : i32
    return %c0_i32, %c0_i32_0 : i32, i32
  }
  func.func @transform_3(%arg0: i32) -> (i32, i32) {
    %c0_i32 = arith.constant 0 : i32
    %c0_i32_0 = arith.constant 0 : i32
    %c0_i32_1 = arith.constant 0 : i32
    return %c0_i32, %c0_i32_0 : i32, i32
  }
  func.func @transform_4(%arg0: i32) -> (i32, i32) {
    %c0_i32 = arith.constant 0 : i32
    %c0_i32_0 = arith.constant 0 : i32
    %c0_i32_1 = arith.constant 0 : i32
    return %c0_i32, %c0_i32_0 : i32, i32
  }
  func.func @transform_5(%arg0: i32) -> (i32, i32) {
    %c0_i32 = arith.constant 0 : i32
    %c0_i32_0 = arith.constant 0 : i32
    %c0_i32_1 = arith.constant 0 : i32
    return %c0_i32, %c0_i32_0 : i32, i32
  }
  func.func @transform_6(%arg0: i32) -> (i32, i32) {
    %c0_i32 = arith.constant 0 : i32
    %c0_i32_0 = arith.constant 0 : i32
    %c0_i32_1 = arith.constant 0 : i32
    return %c0_i32, %c0_i32_0 : i32, i32
  }
  func.func @transform_7(%arg0: i32) -> (i32, i32) {
    %c0_i32 = arith.constant 0 : i32
    %c0_i32_0 = arith.constant 0 : i32
    %c0_i32_1 = arith.constant 0 : i32
    return %c0_i32, %c0_i32_0 : i32, i32
  }
  func.func @transform_8(%arg0: i32) -> (i32, i32) {
    %c0_i32 = arith.constant 0 : i32
    %c0_i32_0 = arith.constant 0 : i32
    %c0_i32_1 = arith.constant 0 : i32
    return %c0_i32, %c0_i32_0 : i32, i32
  }
  func.func @transform_9(%arg0: i32) -> (i32, i32) {
    %c0_i32 = arith.constant 0 : i32
    %c0_i32_0 = arith.constant 0 : i32
    return %arg0, %c0_i32 : i32, i32
  }
  func.func @transform_10(%arg0: i32) -> (i32, i32) {
    %c0_i32 = arith.constant 0 : i32
    %c0_i32_0 = arith.constant 0 : i32
    return %arg0, %c0_i32 : i32, i32
  }
  func.func @transform_11(%arg0: i32) -> (i32, i32) {
    %c0_i32 = arith.constant 0 : i32
    %c0_i32_0 = arith.constant 0 : i32
    return %arg0, %c0_i32 : i32, i32
  }
}

</mosaic_0001>

<bundles_post_ra>
// kernel: vae_forward.1
= control target key start
LH: loop header
LB: loop body
LE: loop exit
PB: predicated region body
PF: predicated region fallthrough
CT: control target
= control target key end

     0   :  { %17 = vsyncpa [#allocation3], 0  ;;  %s6346_s0 = inlined_call_operand.vmem [shape: bf16[8,896], index: 0, kind: input, shape index: {}]   ;;  %s6347_s1 = inlined_call_operand.hbm [shape: bf16[896,512], index: 1, kind: input, shape index: {}]   ;;  %s6348_s2 = inlined_call_operand.vmem [shape: f32[1,512], index: 2, kind: input, shape index: {}]   ;;  %s6349_s3 = inlined_call_operand.hbm [shape: bf16[512,256], index: 3, kind: input, shape index: {}]   ;;  %s6350_s4 = inlined_call_operand.vmem [shape: f32[1,256], index: 4, kind: input, shape index: {}]   ;;  %s6351_s5 = inlined_call_operand.hbm [shape: bf16[128,512], index: 5, kind: input, shape index: {}]   ;;  %s6352_s6 = inlined_call_operand.vmem [shape: f32[1,512], index: 6, kind: input, shape index: {}]   ;;  %s6353_s7 = inlined_call_operand.hbm [shape: bf16[512,896], index: 7, kind: input, shape index: {}]   ;;  %s6354_s8 = inlined_call_operand.vmem [shape: f32[1,896], index: 8, kind: input, shape index: {}]   ;;  %s6355_s9 = inlined_call_operand.vmem [shape: bf16[8,128], index: 9, kind: input, shape index: {}]   ;;  %s6356_s10 = inlined_call_operand.vmem [shape: bf16[8,896], index: 10, kind: output, shape index: {0}]   ;;  %s6357_s11 = inlined_call_operand.vmem [shape: f32[8,256], index: 11, kind: output, shape index: {1}]  }
   0x1   :  { %18 = vsyncpa [#allocation5], 0 }
   0x2   :  { %19 = vsyncpa [#allocation8], 0  ;;  %s6077_s17 = smov [#allocation4]   ;;  %s5983_s21 = scalar_lea.hbm %s6349_s3, 8192 }
   0x3   :  { %s41_s18 = sshll.u32 %s6077_s17, 4  ;;  %p5984_p0 = scmp.ne.s32.totalorder %s6349_s3, %s5983_s21  ;;  %s42_s18 = int_to_ptr.vmem [resolvable:$true] %s41_s18 }
   0x4   :  { %p5987_p1 = scmp.lt.u32.totalorder %s5983_s21, %s6349_s3 }
   0x6   :  { %p5989_p2 = pnand %p5987_p1, %p5984_p0 }
   0x8   :  { %5992 = shalt.err (!%p5989_p2)
}
   0x9   :  { %s5993_s26 = scalar_lea.vmem %s42_s18, 8192  ;;  %p5998_p4 = scmp.lt.s32.totalorder %s42_s18, %s42_s18 }
   0xa   :  { %p5994_p3 = scmp.ne.s32.totalorder %s42_s18, %s5993_s26  ;;  %p5999_p5 = scmp.lt.s32.totalorder %s5993_s26, %s5993_s26 }
   0xc   :  { %p6000_p6 = por %p5999_p5, %p5998_p4 }
   0xe   :  { %p6001_p7 = pnand %p6000_p6, %p5994_p3 }
  0x10   :  { %6004 = shalt.err (!%p6001_p7)
}
  0x11   :  { %s6078_s27 = smov 128   ;;  %s6079_s28 = smov 8  }
  0x12   :  { %47 = dma.hbm_to_vmem [thread:$0]  %s6349_s3, 8192, %s42_s18, [#allocation5], %s6078_s27, %s6078_s27, %s6079_s28  }
  0x13   :  { %s6080_s12 = smov [#allocation2]   ;;  %s6005_s16 = scalar_lea.hbm %s6347_s1, 28672 }
  0x14   :  { %s27_s13 = sshll.u32 %s6080_s12, 4  ;;  %p6006_p8 = scmp.ne.s32.totalorder %s6347_s1, %s6005_s16  ;;  %s28_s13 = int_to_ptr.vmem [resolvable:$true] %s27_s13 }
  0x15   :  { %p6009_p9 = scmp.lt.u32.totalorder %s6005_s16, %s6347_s1 }
  0x17   :  { %p6011_p10 = pnand %p6009_p9, %p6006_p8 }
  0x19   :  { %6014 = shalt.err (!%p6011_p10)
}
  0x1a   :  { %s6015_s22 = scalar_lea.vmem %s28_s13, 28672  ;;  %p6020_p12 = scmp.lt.s32.totalorder %s28_s13, %s28_s13 }
  0x1b   :  { %p6016_p11 = scmp.ne.s32.totalorder %s28_s13, %s6015_s22  ;;  %p6021_p13 = scmp.lt.s32.totalorder %s6015_s22, %s6015_s22 }
  0x1d   :  { %p6022_p0 = por %p6021_p13, %p6020_p12 }
  0x1f   :  { %p6023_p1 = pnand %p6022_p0, %p6016_p11 }
  0x21   :  { %6026 = shalt.err (!%p6023_p1)
}
  0x22   :  { %s6081_s3 = smov 256   ;;  %s6082_s18 = smov 16  }
  0x23   :  { %33 = dma.hbm_to_vmem [thread:$0]  %s6347_s1, 28672, %s28_s13, [#allocation3], %s6081_s3, %s6081_s3, %s6082_s18  }
  0x24   :  { %s6083_s25 = smov [#allocation6]   ;;  %s6084_s27 = smov [#allocation7]  }
  0x25   :  { %s55_s26 = sshll.u32 %s6083_s25, 4  ;;  %s69_s28 = sshll.u32 %s6084_s27, 4  ;;  %s56_s26 = int_to_ptr.vmem [resolvable:$true] %s55_s26  ;;  %s6172_s28 = int_to_ptr.vmem [resolvable:$true] %s69_s28 }
  0x26   :  { %s6027_s12 = scalar_lea.hbm %s6351_s5, 4096 }
  0x27   :  { %p6028_p2 = scmp.ne.s32.totalorder %s6351_s5, %s6027_s12  ;;  %p6031_p3 = scmp.lt.u32.totalorder %s6027_s12, %s6351_s5 }
  0x29   :  { %p6033_p4 = pnand %p6031_p3, %p6028_p2 }
  0x2b   :  { %6036 = shalt.err (!%p6033_p4)
}
  0x2c   :  { %s6037_s1 = scalar_lea.vmem %s56_s26, 4096  ;;  %p6042_p6 = scmp.lt.s32.totalorder %s56_s26, %s56_s26 }
  0x2d   :  { %p6038_p5 = scmp.ne.s32.totalorder %s56_s26, %s6037_s1  ;;  %p6043_p7 = scmp.lt.s32.totalorder %s6037_s1, %s6037_s1 }
  0x2f   :  { %p6044_p8 = por %p6043_p7, %p6042_p6 }
  0x31   :  { %p6045_p9 = pnand %p6044_p8, %p6038_p5 }
  0x33   :  { %6048 = shalt.err (!%p6045_p9)
}
  0x34   :  { %61 = dma.hbm_to_vmem [thread:$0]  %s6351_s5, 4096, %s56_s26, [#allocation5], %s6081_s3, %s6081_s3, %s6082_s18  }
  0x35   :  { %s6049_s22 = scalar_lea.hbm %s6353_s7, 28672 }
  0x36   :  { %p6050_p10 = scmp.ne.s32.totalorder %s6353_s7, %s6049_s22  ;;  %p6053_p11 = scmp.lt.u32.totalorder %s6049_s22, %s6353_s7 }
  0x38   :  { %p6055_p12 = pnand %p6053_p11, %p6050_p10 }
  0x3a   :  { %6058 = shalt.err (!%p6055_p12)
}
  0x3b   :  { %s6059_s29 = scalar_lea.vmem %s6172_s28, 28672  ;;  %p6064_p0 = scmp.lt.s32.totalorder %s6172_s28, %s6172_s28 }
  0x3c   :  { %p6060_p13 = scmp.ne.s32.totalorder %s6172_s28, %s6059_s29  ;;  %p6065_p1 = scmp.lt.s32.totalorder %s6059_s29, %s6059_s29 }
  0x3e   :  { %p6066_p2 = por %p6065_p1, %p6064_p0 }
  0x40   :  { %p6067_p3 = pnand %p6066_p2, %p6060_p13 }
  0x42   :  { %6070 = shalt.err (!%p6067_p3)
}
  0x43   :  { %s6085_s5 = smov 448   ;;  %s6086_s3 = smov 28  }
  0x44   :  { %75 = dma.hbm_to_vmem [thread:$0]  %s6353_s7, 28672, %s6172_s28, [#allocation8], %s6085_s5, %s6085_s5, %s6086_s3  }
  0x45   :  { %6071 = dma.done.wait [#allocation3], 28672  }
  0x46   :  { %6072 = vsyncadd [#allocation3], 4294938624 }
  0x47   :  { %6073 = dma.done.wait [#allocation5], 12288  }
  0x48   :  { %6074 = vsyncadd [#allocation5], 4294955008 }
  0x49   :  { %6075 = dma.done.wait [#allocation8], 28672  }
  0x4a   :  { %6076 = vsyncadd [#allocation8], 4294938624  ;;  %v5146_v0 = vld [vmem:[#allocation2 + $0x4] ss:$16 sps:$4 sm:$0xff]   ;;  %v5148_v1 = vld [vmem:[#allocation2 + $0xc] ss:$16 sps:$4 sm:$0xff]  }
  0x4b   :  { %1488 = vmatprep.subr.bf16.mxu0 %v5146_v0  ;;  %v5150_v2 = vld [vmem:[#allocation2] ss:$16 sps:$4 sm:$0xff]   ;;  %v5151_v3 = vld [vmem:[#allocation2 + $0x8] ss:$16 sps:$4 sm:$0xff]   ;;  %1652 = vmatprep.subr.bf16.mxu1 %v5148_v1  ;;  %v5152_v4 = vld [vmem:[#allocation2 + $0x24] ss:$16 sps:$4 sm:$0xff]  }
  0x4c   :  { %1489 = vmatpush1.bf16.msra.mxu0 %v5150_v2  ;;  %1653 = vmatpush1.bf16.msra.mxu1 %v5151_v3  ;;  %v5154_v5 = vld [vmem:[#allocation2 + $0x2c] ss:$16 sps:$4 sm:$0xff]   ;;  %v5156_v6 = vld [vmem:[#allocation2 + $0x20] ss:$16 sps:$4 sm:$0xff]   ;;  %v5157_v7 = vld [vmem:[#allocation2 + $0x28] ss:$16 sps:$4 sm:$0xff]  }
  0x4d   :  { %1490 = vmatprep.subr.bf16.mxu0 %v5152_v4  ;;  %1654 = vmatprep.subr.bf16.mxu1 %v5154_v5  ;;  %v5158_v8 = vld [vmem:[#allocation2 + $0x44] ss:$16 sps:$4 sm:$0xff]   ;;  %v5160_v9 = vld [vmem:[#allocation2 + $0x4c] ss:$16 sps:$4 sm:$0xff]   ;;  %v5162_v10 = vld [vmem:[#allocation2 + $0x40] ss:$16 sps:$4 sm:$0xff]  }
  0x4e   :  { %v5163_v11 = vld [vmem:[#allocation2 + $0x48] ss:$16 sps:$4 sm:$0xff]   ;;  %v5164_v12 = vld [vmem:[#allocation2 + $0x64] ss:$16 sps:$4 sm:$0xff]   ;;  %v5166_v13 = vld [vmem:[#allocation2 + $0x6c] ss:$16 sps:$4 sm:$0xff]  }
  0x4f   :  { %v5168_v14 = vld [vmem:[#allocation2 + $0x60] ss:$16 sps:$4 sm:$0xff]   ;;  %v5169_v15 = vld [vmem:[#allocation2 + $0x68] ss:$16 sps:$4 sm:$0xff]   ;;  %v5170_v16 = vld [vmem:[#allocation2 + $0x84] ss:$16 sps:$4 sm:$0xff]  }
  0x50   :  { %1491 = vmatpush1.bf16.msra.mxu0 %v5156_v6  ;;  %1655 = vmatpush1.bf16.msra.mxu1 %v5157_v7  ;;  %v5172_v17 = vld [vmem:[#allocation2 + $0x8c] ss:$16 sps:$4 sm:$0xff]   ;;  %v5174_v18 = vld [vmem:[#allocation2 + $0x80] ss:$16 sps:$4 sm:$0xff]   ;;  %v5175_v19 = vld [vmem:[#allocation2 + $0x88] ss:$16 sps:$4 sm:$0xff]  }
  0x51   :  { %1492 = vmatprep.subr.bf16.mxu0 %v5158_v8  ;;  %1656 = vmatprep.subr.bf16.mxu1 %v5160_v9  ;;  %v5176_v20 = vld [vmem:[#allocation2 + $0xa4] ss:$16 sps:$4 sm:$0xff]   ;;  %v5178_v21 = vld [vmem:[#allocation2 + $0xac] ss:$16 sps:$4 sm:$0xff]   ;;  %v5180_v22 = vld [vmem:[#allocation2 + $0xa0] ss:$16 sps:$4 sm:$0xff]  }
  0x52   :  { %v5181_v23 = vld [vmem:[#allocation2 + $0xa8] ss:$16 sps:$4 sm:$0xff]   ;;  %v5182_v24 = vld [vmem:[#allocation2 + $0xc4] ss:$16 sps:$4 sm:$0xff]   ;;  %v5184_v25 = vld [vmem:[#allocation2 + $0xcc] ss:$16 sps:$4 sm:$0xff]  }
  0x53   :  { %v5186_v26 = vld [vmem:[#allocation2 + $0xc0] ss:$16 sps:$4 sm:$0xff]   ;;  %v5187_v27 = vld [vmem:[#allocation2 + $0xc8] ss:$16 sps:$4 sm:$0xff]   ;;  %v5188_v28 = vld [vmem:[#allocation2 + $0xe4] ss:$16 sps:$4 sm:$0xff]  }
  0x54   :  { %1493 = vmatpush1.bf16.msra.mxu0 %v5162_v10  ;;  %1657 = vmatpush1.bf16.msra.mxu1 %v5163_v11  ;;  %v5190_v29 = vld [vmem:[#allocation2 + $0xec] ss:$16 sps:$4 sm:$0xff]   ;;  %v5192_v30 = vld [vmem:[#allocation2 + $0xe0] ss:$16 sps:$4 sm:$0xff]   ;;  %v5193_v31 = vld [vmem:[#allocation2 + $0xe8] ss:$16 sps:$4 sm:$0xff]  }
  0x55   :  { %1494 = vmatprep.subr.bf16.mxu0 %v5164_v12  ;;  %1658 = vmatprep.subr.bf16.mxu1 %v5166_v13  ;;  %v5194_v32 = vld [vmem:[#allocation2 + $0x104] ss:$16 sps:$4 sm:$0xff]   ;;  %v5196_v33 = vld [vmem:[#allocation2 + $0x10c] ss:$16 sps:$4 sm:$0xff]   ;;  %v5198_v34 = vld [vmem:[#allocation2 + $0x100] ss:$16 sps:$4 sm:$0xff]  }
  0x56   :  { %v5199_v35 = vld [vmem:[#allocation2 + $0x108] ss:$16 sps:$4 sm:$0xff]   ;;  %v5200_v36 = vld [vmem:[#allocation2 + $0x124] ss:$16 sps:$4 sm:$0xff]   ;;  %v5202_v37 = vld [vmem:[#allocation2 + $0x12c] ss:$16 sps:$4 sm:$0xff]  }
  0x57   :  { %v5204_v38 = vld [vmem:[#allocation2 + $0x120] ss:$16 sps:$4 sm:$0xff]   ;;  %v5205_v39 = vld [vmem:[#allocation2 + $0x128] ss:$16 sps:$4 sm:$0xff]   ;;  %v5206_v40 = vld [vmem:[#allocation2 + $0x144] ss:$16 sps:$4 sm:$0xff]  }
  0x58   :  { %1495 = vmatpush1.bf16.msra.mxu0 %v5168_v14  ;;  %1659 = vmatpush1.bf16.msra.mxu1 %v5169_v15  ;;  %v5208_v41 = vld [vmem:[#allocation2 + $0x14c] ss:$16 sps:$4 sm:$0xff]   ;;  %v5210_v42 = vld [vmem:[#allocation2 + $0x140] ss:$16 sps:$4 sm:$0xff]   ;;  %v5211_v43 = vld [vmem:[#allocation2 + $0x148] ss:$16 sps:$4 sm:$0xff]  }
  0x59   :  { %1496 = vmatprep.subr.bf16.mxu0 %v5170_v16  ;;  %1660 = vmatprep.subr.bf16.mxu1 %v5172_v17  ;;  %v5212_v44 = vld [vmem:[#allocation2 + $0x164] ss:$16 sps:$4 sm:$0xff]   ;;  %v5214_v45 = vld [vmem:[#allocation2 + $0x16c] ss:$16 sps:$4 sm:$0xff]   ;;  %v5216_v47 = vld [vmem:[#allocation2 + $0x160] ss:$16 sps:$4 sm:$0xff]  }
  0x5a   :  { %v93_v46 = vld [vmem:[%s6346_s0] sm:$0xff]  ;;  %v5217_v49 = vld [vmem:[#allocation2 + $0x168] ss:$16 sps:$4 sm:$0xff]   ;;  %v5220_v51 = vld [vmem:[#allocation2 + $0x18c] ss:$16 sps:$4 sm:$0xff]  }
  0x5b   :  { %v4474_v48 = vcombine.high %v93_v46, %v93_v46  ;;  %v5218_v50 = vld [vmem:[#allocation2 + $0x184] ss:$16 sps:$4 sm:$0xff]   ;;  %v5222_v52 = vld [vmem:[#allocation2 + $0x180] ss:$16 sps:$4 sm:$0xff]   ;;  %v5223_v53 = vld [vmem:[#allocation2 + $0x188] ss:$16 sps:$4 sm:$0xff]   ;;  %v4473_v4 = vcombine.low %v93_v46, %v93_v46 }
  0x5c   :  { %1497 = vmatpush1.bf16.msra.mxu0 %v5174_v18  ;;  %1661 = vmatpush1.bf16.msra.mxu1 %v5175_v19  ;;  %v5224_v54 = vld [vmem:[#allocation2 + $0x1a4] ss:$16 sps:$4 sm:$0xff]   ;;  %v5226_v55 = vld [vmem:[#allocation2 + $0x1ac] ss:$16 sps:$4 sm:$0xff]   ;;  %v5228_v56 = vld [vmem:[#allocation2 + $0x1a0] ss:$16 sps:$4 sm:$0xff]  }
  0x5d   :  { %1498 = vmatprep.subr.bf16.mxu0 %v5176_v20  ;;  %1662 = vmatprep.subr.bf16.mxu1 %v5178_v21  ;;  %v5229_v57 = vld [vmem:[#allocation2 + $0x1a8] ss:$16 sps:$4 sm:$0xff]   ;;  %v5230_v58 = vld [vmem:[#allocation2 + $0x1c4] ss:$16 sps:$4 sm:$0xff]   ;;  %v5232_v59 = vld [vmem:[#allocation2 + $0x1cc] ss:$16 sps:$4 sm:$0xff]  }
  0x5e   :  { %1520 = vmatprep.mubr.bf16.mxu0 %v4474_v48  ;;  %1684 = vmatprep.mubr.bf16.mxu1 %v4474_v48  ;;  %v5234_v60 = vld [vmem:[#allocation2 + $0x1c0] ss:$16 sps:$4 sm:$0xff]   ;;  %v5235_v61 = vld [vmem:[#allocation2 + $0x1c8] ss:$16 sps:$4 sm:$0xff]   ;;  %v5236_v62 = vld [vmem:[#allocation2 + $0x1e4] ss:$16 sps:$4 sm:$0xff]  }
  0x5f   :  { %v5238_v63 = vld [vmem:[#allocation2 + $0x1ec] ss:$16 sps:$4 sm:$0xff]   ;;  %v5240_v0 = vld [vmem:[#allocation2 + $0x1e0] ss:$16 sps:$4 sm:$0xff]   ;;  %v5241_v1 = vld [vmem:[#allocation2 + $0x1e8] ss:$16 sps:$4 sm:$0xff]  }
  0x60   :  { %1499 = vmatpush1.bf16.msra.mxu0 %v5180_v22  ;;  %1663 = vmatpush1.bf16.msra.mxu1 %v5181_v23  ;;  %v5246_v2 = vld [vmem:[#allocation2 + $0x204] ss:$16 sps:$4 sm:$0xff]   ;;  %v5249_v3 = vld [vmem:[#allocation2 + $0x20c] ss:$16 sps:$4 sm:$0xff]   ;;  %v5244_v5 = vld [vmem:[#allocation2 + $0x200] ss:$16 sps:$4 sm:$0xff]  }
  0x61   :  { %1500 = vmatprep.subr.bf16.mxu0 %v5182_v24  ;;  %1664 = vmatprep.subr.bf16.mxu1 %v5184_v25  ;;  %v5247_v6 = vld [vmem:[#allocation2 + $0x208] ss:$16 sps:$4 sm:$0xff]   ;;  %v5252_v7 = vld [vmem:[#allocation2 + $0x224] ss:$16 sps:$4 sm:$0xff]   ;;  %v5255_v8 = vld [vmem:[#allocation2 + $0x22c] ss:$16 sps:$4 sm:$0xff]  }
  0x62   :  { %v5250_v9 = vld [vmem:[#allocation2 + $0x220] ss:$16 sps:$4 sm:$0xff]   ;;  %v5253_v10 = vld [vmem:[#allocation2 + $0x228] ss:$16 sps:$4 sm:$0xff]   ;;  %v5258_v11 = vld [vmem:[#allocation2 + $0x244] ss:$16 sps:$4 sm:$0xff]  }
  0x63   :  { %v5261_v12 = vld [vmem:[#allocation2 + $0x24c] ss:$16 sps:$4 sm:$0xff]   ;;  %v5256_v13 = vld [vmem:[#allocation2 + $0x240] ss:$16 sps:$4 sm:$0xff]   ;;  %v5259_v14 = vld [vmem:[#allocation2 + $0x248] ss:$16 sps:$4 sm:$0xff]  }
  0x64   :  { %1501 = vmatpush1.bf16.msra.mxu0 %v5186_v26  ;;  %1665 = vmatpush1.bf16.msra.mxu1 %v5187_v27  ;;  %v5264_v15 = vld [vmem:[#allocation2 + $0x264] ss:$16 sps:$4 sm:$0xff]   ;;  %v5267_v16 = vld [vmem:[#allocation2 + $0x26c] ss:$16 sps:$4 sm:$0xff]   ;;  %v5262_v17 = vld [vmem:[#allocation2 + $0x260] ss:$16 sps:$4 sm:$0xff]  }
  0x65   :  { %1502 = vmatprep.subr.bf16.mxu0 %v5188_v28  ;;  %1666 = vmatprep.subr.bf16.mxu1 %v5190_v29  ;;  %v5265_v18 = vld [vmem:[#allocation2 + $0x268] ss:$16 sps:$4 sm:$0xff]   ;;  %v5270_v19 = vld [vmem:[#allocation2 + $0x284] ss:$16 sps:$4 sm:$0xff]   ;;  %v5273_v20 = vld [vmem:[#allocation2 + $0x28c] ss:$16 sps:$4 sm:$0xff]  }
  0x66   :  { %v5268_v21 = vld [vmem:[#allocation2 + $0x280] ss:$16 sps:$4 sm:$0xff]   ;;  %v5271_v22 = vld [vmem:[#allocation2 + $0x288] ss:$16 sps:$4 sm:$0xff]   ;;  %v5276_v23 = vld [vmem:[#allocation2 + $0x2a4] ss:$16 sps:$4 sm:$0xff]  }
  0x67   :  { %v5279_v24 = vld [vmem:[#allocation2 + $0x2ac] ss:$16 sps:$4 sm:$0xff]   ;;  %v5274_v25 = vld [vmem:[#allocation2 + $0x2a0] ss:$16 sps:$4 sm:$0xff]   ;;  %v5277_v26 = vld [vmem:[#allocation2 + $0x2a8] ss:$16 sps:$4 sm:$0xff]  }
  0x68   :  { %1503 = vmatpush1.bf16.msra.mxu0 %v5192_v30  ;;  %1667 = vmatpush1.bf16.msra.mxu1 %v5193_v31  ;;  %v5282_v27 = vld [vmem:[#allocation2 + $0x2c4] ss:$16 sps:$4 sm:$0xff]   ;;  %v5285_v28 = vld [vmem:[#allocation2 + $0x2cc] ss:$16 sps:$4 sm:$0xff]   ;;  %v5280_v31 = vld [vmem:[#allocation2 + $0x2c0] ss:$16 sps:$4 sm:$0xff]  }
  0x69   :  { %1504 = vmatprep.subr.bf16.mxu0 %v5194_v32  ;;  %1668 = vmatprep.subr.bf16.mxu1 %v5196_v33  ;;  %v6209_v29 = vld [vmem:[%s6346_s0 + $0x8] sm:$0xff]  ;;  %v5288_v33 = vld [vmem:[#allocation2 + $0x2e4] ss:$16 sps:$4 sm:$0xff]  }
  0x6a   :  { %v4476_v30 = vcombine.high %v6209_v29, %v6209_v29  ;;  %v5283_v32 = vld [vmem:[#allocation2 + $0x2c8] ss:$16 sps:$4 sm:$0xff]   ;;  %v5309_v46 = vld [vmem:[#allocation2 + $0x34c] ss:$16 sps:$4 sm:$0xff]  }
  0x6b   :  { %v5307_v48 = vld [vmem:[#allocation2 + $0x348] ss:$16 sps:$4 sm:$0xff]  }
  0x6c   :  { %1505 = vmatpush1.bf16.msra.mxu0 %v5198_v34  ;;  %1669 = vmatpush1.bf16.msra.mxu1 %v5199_v35  ;;  %v5291_v34 = vld [vmem:[#allocation2 + $0x2ec] ss:$16 sps:$4 sm:$0xff]   ;;  %v5286_v35 = vld [vmem:[#allocation2 + $0x2e0] ss:$16 sps:$4 sm:$0xff]  }
  0x6d   :  { %1506 = vmatprep.subr.bf16.mxu0 %v5200_v36  ;;  %1670 = vmatprep.subr.bf16.mxu1 %v5202_v37  ;;  %v5289_v36 = vld [vmem:[#allocation2 + $0x2e8] ss:$16 sps:$4 sm:$0xff]   ;;  %v5294_v37 = vld [vmem:[#allocation2 + $0x304] ss:$16 sps:$4 sm:$0xff]  }
  0x70   :  { %1507 = vmatpush1.bf16.msra.mxu0 %v5204_v38  ;;  %1671 = vmatpush1.bf16.msra.mxu1 %v5205_v39  ;;  %v5297_v38 = vld [vmem:[#allocation2 + $0x30c] ss:$16 sps:$4 sm:$0xff]   ;;  %v5292_v39 = vld [vmem:[#allocation2 + $0x300] ss:$16 sps:$4 sm:$0xff]  }
  0x71   :  { %1508 = vmatprep.subr.bf16.mxu0 %v5206_v40  ;;  %1672 = vmatprep.subr.bf16.mxu1 %v5208_v41  ;;  %v5295_v40 = vld [vmem:[#allocation2 + $0x308] ss:$16 sps:$4 sm:$0xff]   ;;  %v5300_v41 = vld [vmem:[#allocation2 + $0x324] ss:$16 sps:$4 sm:$0xff]  }
  0x74   :  { %1509 = vmatpush1.bf16.msra.mxu0 %v5210_v42  ;;  %1673 = vmatpush1.bf16.msra.mxu1 %v5211_v43  ;;  %v5303_v42 = vld [vmem:[#allocation2 + $0x32c] ss:$16 sps:$4 sm:$0xff]   ;;  %v5298_v43 = vld [vmem:[#allocation2 + $0x320] ss:$16 sps:$4 sm:$0xff]  }
  0x75   :  { %1510 = vmatprep.subr.bf16.mxu0 %v5212_v44  ;;  %1674 = vmatprep.subr.bf16.mxu1 %v5214_v45  ;;  %v5301_v44 = vld [vmem:[#allocation2 + $0x328] ss:$16 sps:$4 sm:$0xff]   ;;  %v5306_v45 = vld [vmem:[#allocation2 + $0x344] ss:$16 sps:$4 sm:$0xff]  }
  0x78   :  { %1511 = vmatpush1.bf16.msra.mxu0 %v5216_v47  ;;  %1675 = vmatpush1.bf16.msra.mxu1 %v5217_v49  ;;  %v5304_v47 = vld [vmem:[#allocation2 + $0x340] ss:$16 sps:$4 sm:$0xff]   ;;  %v5312_v49 = vld [vmem:[#allocation2 + $0x364] ss:$16 sps:$4 sm:$0xff]  }
  0x79   :  { %1512 = vmatprep.subr.bf16.mxu0 %v5218_v50  ;;  %1676 = vmatprep.subr.bf16.mxu1 %v5220_v51  ;;  %v5315_v50 = vld [vmem:[#allocation2 + $0x36c] ss:$16 sps:$4 sm:$0xff]   ;;  %v5310_v51 = vld [vmem:[#allocation2 + $0x360] ss:$16 sps:$4 sm:$0xff]  }
  0x7c   :  { %1513 = vmatpush1.bf16.msra.mxu0 %v5222_v52  ;;  %1677 = vmatpush1.bf16.msra.mxu1 %v5223_v53  ;;  %v5313_v52 = vld [vmem:[#allocation2 + $0x368] ss:$16 sps:$4 sm:$0xff]   ;;  %v5318_v53 = vld [vmem:[#allocation2 + $0x384] ss:$16 sps:$4 sm:$0xff]  }
  0x7d   :  { %1514 = vmatprep.subr.bf16.mxu0 %v5224_v54  ;;  %1678 = vmatprep.subr.bf16.mxu1 %v5226_v55  ;;  %v5321_v54 = vld [vmem:[#allocation2 + $0x38c] ss:$16 sps:$4 sm:$0xff]   ;;  %v5316_v55 = vld [vmem:[#allocation2 + $0x380] ss:$16 sps:$4 sm:$0xff]  }
  0x80   :  { %1515 = vmatpush1.bf16.msra.mxu0 %v5228_v56  ;;  %1679 = vmatpush1.bf16.msra.mxu1 %v5229_v57  ;;  %v5319_v56 = vld [vmem:[#allocation2 + $0x388] ss:$16 sps:$4 sm:$0xff]   ;;  %v5324_v57 = vld [vmem:[#allocation2 + $0x3a4] ss:$16 sps:$4 sm:$0xff]  }
  0x81   :  { %1516 = vmatprep.subr.bf16.mxu0 %v5230_v58  ;;  %1680 = vmatprep.subr.bf16.mxu1 %v5232_v59  ;;  %v5327_v58 = vld [vmem:[#allocation2 + $0x3ac] ss:$16 sps:$4 sm:$0xff]   ;;  %v5322_v59 = vld [vmem:[#allocation2 + $0x3a0] ss:$16 sps:$4 sm:$0xff]  }
  0x84   :  { %1517 = vmatpush1.bf16.msra.mxu0 %v5234_v60  ;;  %1681 = vmatpush1.bf16.msra.mxu1 %v5235_v61  ;;  %v5325_v60 = vld [vmem:[#allocation2 + $0x3a8] ss:$16 sps:$4 sm:$0xff]   ;;  %v5330_v61 = vld [vmem:[#allocation2 + $0x3c4] ss:$16 sps:$4 sm:$0xff]  }
  0x85   :  { %1518 = vmatprep.subr.bf16.mxu0 %v5236_v62  ;;  %1682 = vmatprep.subr.bf16.mxu1 %v5238_v63  ;;  %v5333_v62 = vld [vmem:[#allocation2 + $0x3cc] ss:$16 sps:$4 sm:$0xff]   ;;  %v5328_v63 = vld [vmem:[#allocation2 + $0x3c0] ss:$16 sps:$4 sm:$0xff]  }
  0x88   :  { %1519 = vmatpush1.bf16.msra.mxu0 %v5240_v0  ;;  %1683 = vmatpush1.bf16.msra.mxu1 %v5241_v1  ;;  %v5331_v0 = vld [vmem:[#allocation2 + $0x3c8] ss:$16 sps:$4 sm:$0xff]   ;;  %v5336_v1 = vld [vmem:[#allocation2 + $0x3e4] ss:$16 sps:$4 sm:$0xff]  }
  0x89   :  { %1529 = vmatprep.subr.bf16.mxu0 %v5246_v2  ;;  %1693 = vmatprep.subr.bf16.mxu1 %v5249_v3  ;;  %v5339_v2 = vld [vmem:[#allocation2 + $0x3ec] ss:$16 sps:$4 sm:$0xff]   ;;  %v5334_v3 = vld [vmem:[#allocation2 + $0x3e0] ss:$16 sps:$4 sm:$0xff]  }
  0x8b   :  { %1521 = vmatmul.mubr.bf16.vlgmr.msra.gmra.mrb[0].mxu0 %v4473_v4  ;;  %1685 = vmatmul.mubr.bf16.vlgmr.msra.gmra.mrb[0].mxu1 %v4473_v4  ;;  %v5337_v4 = vld [vmem:[#allocation2 + $0x3e8] ss:$16 sps:$4 sm:$0xff]  }
  0x8c   :  { %1530 = vmatpush1.bf16.msra.mxu0 %v5244_v5  ;;  %1694 = vmatpush1.bf16.msra.mxu1 %v5247_v6  ;;  %v5344_v5 = vld [vmem:[#allocation2 + $0x404] ss:$16 sps:$4 sm:$0xff]   ;;  %v5347_v6 = vld [vmem:[#allocation2 + $0x40c] ss:$16 sps:$4 sm:$0xff]  }
  0x8d   :  { %1531 = vmatprep.subr.bf16.mxu0 %v5252_v7  ;;  %1695 = vmatprep.subr.bf16.mxu1 %v5255_v8  ;;  %v4475_v7 = vcombine.low %v6209_v29, %v6209_v29  ;;  %v5342_v8 = vld [vmem:[#allocation2 + $0x400] ss:$16 sps:$4 sm:$0xff]   ;;  %v5377_v29 = vld [vmem:[#allocation2 + $0x4ac] ss:$16 sps:$4 sm:$0xff]  }
  0x8e   :  { %1561 = vmatprep.mubr.bf16.mxu0 %v4476_v30  ;;  %1725 = vmatprep.mubr.bf16.mxu1 %v4476_v30  ;;  %v5372_v30 = vld [vmem:[#allocation2 + $0x4a0] ss:$16 sps:$4 sm:$0xff]  }
  0x90   :  { %1532 = vmatpush1.bf16.msra.mxu0 %v5250_v9  ;;  %1696 = vmatpush1.bf16.msra.mxu1 %v5253_v10  ;;  %v5345_v9 = vld [vmem:[#allocation2 + $0x408] ss:$16 sps:$4 sm:$0xff]   ;;  %v5350_v10 = vld [vmem:[#allocation2 + $0x424] ss:$16 sps:$4 sm:$0xff]  }
  0x91   :  { %1533 = vmatprep.subr.bf16.mxu0 %v5258_v11  ;;  %1697 = vmatprep.subr.bf16.mxu1 %v5261_v12  ;;  %v6218_v11 = vld [vmem:[%s6346_s0 + $0x10] sm:$0xff]  ;;  %v5353_v12 = vld [vmem:[#allocation2 + $0x42c] ss:$16 sps:$4 sm:$0xff]  }
  0x94   :  { %1534 = vmatpush1.bf16.msra.mxu0 %v5256_v13  ;;  %1698 = vmatpush1.bf16.msra.mxu1 %v5259_v14  ;;  %v4478_v13 = vcombine.high %v6218_v11, %v6218_v11  ;;  %v5348_v14 = vld [vmem:[#allocation2 + $0x420] ss:$16 sps:$4 sm:$0xff]  }
  0x95   :  { %1535 = vmatprep.subr.bf16.mxu0 %v5264_v15  ;;  %1699 = vmatprep.subr.bf16.mxu1 %v5267_v16  ;;  %v5351_v15 = vld [vmem:[#allocation2 + $0x428] ss:$16 sps:$4 sm:$0xff]   ;;  %v5356_v16 = vld [vmem:[#allocation2 + $0x444] ss:$16 sps:$4 sm:$0xff]  }
  0x98   :  { %1536 = vmatpush1.bf16.msra.mxu0 %v5262_v17  ;;  %1700 = vmatpush1.bf16.msra.mxu1 %v5265_v18  ;;  %v5359_v17 = vld [vmem:[#allocation2 + $0x44c] ss:$16 sps:$4 sm:$0xff]   ;;  %v5354_v18 = vld [vmem:[#allocation2 + $0x440] ss:$16 sps:$4 sm:$0xff]  }
  0x99   :  { %1537 = vmatprep.subr.bf16.mxu0 %v5270_v19  ;;  %1701 = vmatprep.subr.bf16.mxu1 %v5273_v20  ;;  %v5357_v19 = vld [vmem:[#allocation2 + $0x448] ss:$16 sps:$4 sm:$0xff]   ;;  %v5362_v20 = vld [vmem:[#allocation2 + $0x464] ss:$16 sps:$4 sm:$0xff]  }
  0x9c   :  { %1538 = vmatpush1.bf16.msra.mxu0 %v5268_v21  ;;  %1702 = vmatpush1.bf16.msra.mxu1 %v5271_v22  ;;  %v5365_v21 = vld [vmem:[#allocation2 + $0x46c] ss:$16 sps:$4 sm:$0xff]   ;;  %v5360_v22 = vld [vmem:[#allocation2 + $0x460] ss:$16 sps:$4 sm:$0xff]  }
  0x9d   :  { %1539 = vmatprep.subr.bf16.mxu0 %v5276_v23  ;;  %1703 = vmatprep.subr.bf16.mxu1 %v5279_v24  ;;  %v5363_v23 = vld [vmem:[#allocation2 + $0x468] ss:$16 sps:$4 sm:$0xff]   ;;  %v5368_v24 = vld [vmem:[#allocation2 + $0x484] ss:$16 sps:$4 sm:$0xff]  }
  0xa0   :  { %1540 = vmatpush1.bf16.msra.mxu0 %v5274_v25  ;;  %1704 = vmatpush1.bf16.msra.mxu1 %v5277_v26  ;;  %v5371_v25 = vld [vmem:[#allocation2 + $0x48c] ss:$16 sps:$4 sm:$0xff]   ;;  %v5366_v26 = vld [vmem:[#allocation2 + $0x480] ss:$16 sps:$4 sm:$0xff]  }
  0xa1   :  { %1541 = vmatprep.subr.bf16.mxu0 %v5282_v27  ;;  %1705 = vmatprep.subr.bf16.mxu1 %v5285_v28  ;;  %v5369_v27 = vld [vmem:[#allocation2 + $0x488] ss:$16 sps:$4 sm:$0xff]   ;;  %v5374_v28 = vld [vmem:[#allocation2 + $0x4a4] ss:$16 sps:$4 sm:$0xff]  }
  0xa4   :  { %1542 = vmatpush1.bf16.msra.mxu0 %v5280_v31  ;;  %1706 = vmatpush1.bf16.msra.mxu1 %v5283_v32  ;;  %v5375_v31 = vld [vmem:[#allocation2 + $0x4a8] ss:$16 sps:$4 sm:$0xff]   ;;  %v5380_v32 = vld [vmem:[#allocation2 + $0x4c4] ss:$16 sps:$4 sm:$0xff]  }
  0xa5   :  { %1543 = vmatprep.subr.bf16.mxu0 %v5288_v33  ;;  %1707 = vmatprep.subr.bf16.mxu1 %v5291_v34  ;;  %v5383_v33 = vld [vmem:[#allocation2 + $0x4cc] ss:$16 sps:$4 sm:$0xff]   ;;  %v5378_v34 = vld [vmem:[#allocation2 + $0x4c0] ss:$16 sps:$4 sm:$0xff]  }
  0xa8   :  { %1544 = vmatpush1.bf16.msra.mxu0 %v5286_v35  ;;  %1708 = vmatpush1.bf16.msra.mxu1 %v5289_v36  ;;  %v5381_v35 = vld [vmem:[#allocation2 + $0x4c8] ss:$16 sps:$4 sm:$0xff]   ;;  %v5386_v36 = vld [vmem:[#allocation2 + $0x4e4] ss:$16 sps:$4 sm:$0xff]  }
  0xa9   :  { %1545 = vmatprep.subr.bf16.mxu0 %v5294_v37  ;;  %1709 = vmatprep.subr.bf16.mxu1 %v5297_v38  ;;  %v5389_v37 = vld [vmem:[#allocation2 + $0x4ec] ss:$16 sps:$4 sm:$0xff]   ;;  %v5384_v38 = vld [vmem:[#allocation2 + $0x4e0] ss:$16 sps:$4 sm:$0xff]  }
  0xac   :  { %1546 = vmatpush1.bf16.msra.mxu0 %v5292_v39  ;;  %1710 = vmatpush1.bf16.msra.mxu1 %v5295_v40  ;;  %v5387_v39 = vld [vmem:[#allocation2 + $0x4e8] ss:$16 sps:$4 sm:$0xff]   ;;  %v5392_v40 = vld [vmem:[#allocation2 + $0x504] ss:$16 sps:$4 sm:$0xff]  }
  0xad   :  { %1547 = vmatprep.subr.bf16.mxu0 %v5300_v41  ;;  %1711 = vmatprep.subr.bf16.mxu1 %v5303_v42  ;;  %v5395_v41 = vld [vmem:[#allocation2 + $0x50c] ss:$16 sps:$4 sm:$0xff]   ;;  %v5390_v42 = vld [vmem:[#allocation2 + $0x500] ss:$16 sps:$4 sm:$0xff]  }
  0xb0   :  { %1548 = vmatpush1.bf16.msra.mxu0 %v5298_v43  ;;  %1712 = vmatpush1.bf16.msra.mxu1 %v5301_v44  ;;  %v5393_v43 = vld [vmem:[#allocation2 + $0x508] ss:$16 sps:$4 sm:$0xff]   ;;  %v5398_v44 = vld [vmem:[#allocation2 + $0x524] ss:$16 sps:$4 sm:$0xff]  }
  0xb1   :  { %1549 = vmatprep.subr.bf16.mxu0 %v5306_v45  ;;  %1713 = vmatprep.subr.bf16.mxu1 %v5309_v46  ;;  %v5401_v45 = vld [vmem:[#allocation2 + $0x52c] ss:$16 sps:$4 sm:$0xff]   ;;  %v5396_v46 = vld [vmem:[#allocation2 + $0x520] ss:$16 sps:$4 sm:$0xff]  }
  0xb4   :  { %1550 = vmatpush1.bf16.msra.mxu0 %v5304_v47  ;;  %1714 = vmatpush1.bf16.msra.mxu1 %v5307_v48  ;;  %v5399_v47 = vld [vmem:[#allocation2 + $0x528] ss:$16 sps:$4 sm:$0xff]   ;;  %v5404_v48 = vld [vmem:[#allocation2 + $0x544] ss:$16 sps:$4 sm:$0xff]  }
  0xb5   :  { %1551 = vmatprep.subr.bf16.mxu0 %v5312_v49  ;;  %1715 = vmatprep.subr.bf16.mxu1 %v5315_v50  ;;  %v5407_v49 = vld [vmem:[#allocation2 + $0x54c] ss:$16 sps:$4 sm:$0xff]   ;;  %v5402_v50 = vld [vmem:[#allocation2 + $0x540] ss:$16 sps:$4 sm:$0xff]  }
  0xb8   :  { %1552 = vmatpush1.bf16.msra.mxu0 %v5310_v51  ;;  %1716 = vmatpush1.bf16.msra.mxu1 %v5313_v52  ;;  %v5405_v51 = vld [vmem:[#allocation2 + $0x548] ss:$16 sps:$4 sm:$0xff]   ;;  %v5410_v52 = vld [vmem:[#allocation2 + $0x564] ss:$16 sps:$4 sm:$0xff]  }
  0xb9   :  { %1553 = vmatprep.subr.bf16.mxu0 %v5318_v53  ;;  %1717 = vmatprep.subr.bf16.mxu1 %v5321_v54  ;;  %v5413_v53 = vld [vmem:[#allocation2 + $0x56c] ss:$16 sps:$4 sm:$0xff]   ;;  %v5408_v54 = vld [vmem:[#allocation2 + $0x560] ss:$16 sps:$4 sm:$0xff]  }
  0xbc   :  { %1554 = vmatpush1.bf16.msra.mxu0 %v5316_v55  ;;  %1718 = vmatpush1.bf16.msra.mxu1 %v5319_v56  ;;  %v5411_v55 = vld [vmem:[#allocation2 + $0x568] ss:$16 sps:$4 sm:$0xff]   ;;  %v5416_v56 = vld [vmem:[#allocation2 + $0x584] ss:$16 sps:$4 sm:$0xff]  }
  0xbd   :  { %1555 = vmatprep.subr.bf16.mxu0 %v5324_v57  ;;  %1719 = vmatprep.subr.bf16.mxu1 %v5327_v58  ;;  %v5419_v57 = vld [vmem:[#allocation2 + $0x58c] ss:$16 sps:$4 sm:$0xff]   ;;  %v5414_v58 = vld [vmem:[#allocation2 + $0x580] ss:$16 sps:$4 sm:$0xff]  }
  0xc0   :  { %1556 = vmatpush1.bf16.msra.mxu0 %v5322_v59  ;;  %1720 = vmatpush1.bf16.msra.mxu1 %v5325_v60  ;;  %v5417_v59 = vld [vmem:[#allocation2 + $0x588] ss:$16 sps:$4 sm:$0xff]   ;;  %v5422_v60 = vld [vmem:[#allocation2 + $0x5a4] ss:$16 sps:$4 sm:$0xff]  }
  0xc1   :  { %1557 = vmatprep.subr.bf16.mxu0 %v5330_v61  ;;  %1721 = vmatprep.subr.bf16.mxu1 %v5333_v62  ;;  %v5425_v61 = vld [vmem:[#allocation2 + $0x5ac] ss:$16 sps:$4 sm:$0xff]   ;;  %v5420_v62 = vld [vmem:[#allocation2 + $0x5a0] ss:$16 sps:$4 sm:$0xff]  }
  0xc4   :  { %1558 = vmatpush1.bf16.msra.mxu0 %v5328_v63  ;;  %1722 = vmatpush1.bf16.msra.mxu1 %v5331_v0  ;;  %v5423_v63 = vld [vmem:[#allocation2 + $0x5a8] ss:$16 sps:$4 sm:$0xff]   ;;  %v5428_v0 = vld [vmem:[#allocation2 + $0x5c4] ss:$16 sps:$4 sm:$0xff]  }
  0xc5   :  { %1559 = vmatprep.subr.bf16.mxu0 %v5336_v1  ;;  %1723 = vmatprep.subr.bf16.mxu1 %v5339_v2  ;;  %v5431_v1 = vld [vmem:[#allocation2 + $0x5cc] ss:$16 sps:$4 sm:$0xff]   ;;  %v5426_v2 = vld [vmem:[#allocation2 + $0x5c0] ss:$16 sps:$4 sm:$0xff]  }
  0xc8   :  { %1560 = vmatpush1.bf16.msra.mxu0 %v5334_v3  ;;  %1724 = vmatpush1.bf16.msra.mxu1 %v5337_v4  ;;  %v5429_v3 = vld [vmem:[#allocation2 + $0x5c8] ss:$16 sps:$4 sm:$0xff]   ;;  %v5434_v4 = vld [vmem:[#allocation2 + $0x5e4] ss:$16 sps:$4 sm:$0xff]  }
  0xc9   :  { %1570 = vmatprep.subr.bf16.mxu0 %v5344_v5  ;;  %1734 = vmatprep.subr.bf16.mxu1 %v5347_v6  ;;  %v5437_v5 = vld [vmem:[#allocation2 + $0x5ec] ss:$16 sps:$4 sm:$0xff]   ;;  %v5432_v6 = vld [vmem:[#allocation2 + $0x5e0] ss:$16 sps:$4 sm:$0xff]  }
  0xcb   :  { %1562 = vmatmul.mubr.bf16.vlgmr.msra.gmra.mrb[0].mxu0 %v4475_v7  ;;  %1726 = vmatmul.mubr.bf16.vlgmr.msra.gmra.mrb[0].mxu1 %v4475_v7  ;;  %v5435_v7 = vld [vmem:[#allocation2 + $0x5e8] ss:$16 sps:$4 sm:$0xff]  }
  0xcc   :  { %1571 = vmatpush1.bf16.msra.mxu0 %v5342_v8  ;;  %1735 = vmatpush1.bf16.msra.mxu1 %v5345_v9  ;;  %v5442_v8 = vld [vmem:[#allocation2 + $0x604] ss:$16 sps:$4 sm:$0xff]   ;;  %v5445_v9 = vld [vmem:[#allocation2 + $0x60c] ss:$16 sps:$4 sm:$0xff]  }
  0xcd   :  { %1572 = vmatprep.subr.bf16.mxu0 %v5350_v10  ;;  %1736 = vmatprep.subr.bf16.mxu1 %v5353_v12  ;;  %v5440_v10 = vld [vmem:[#allocation2 + $0x600] ss:$16 sps:$4 sm:$0xff]   ;;  %v5443_v12 = vld [vmem:[#allocation2 + $0x608] ss:$16 sps:$4 sm:$0xff]  }
  0xce   :  { %1602 = vmatprep.mubr.bf16.mxu0 %v4478_v13  ;;  %1766 = vmatprep.mubr.bf16.mxu1 %v4478_v13  ;;  %v4477_v13 = vcombine.low %v6218_v11, %v6218_v11  ;;  %v5460_v11 = vld [vmem:[#allocation2 + $0x664] ss:$16 sps:$4 sm:$0xff]  }
  0xd0   :  { %1573 = vmatpush1.bf16.msra.mxu0 %v5348_v14  ;;  %1737 = vmatpush1.bf16.msra.mxu1 %v5351_v15  ;;  %v5448_v14 = vld [vmem:[#allocation2 + $0x624] ss:$16 sps:$4 sm:$0xff]   ;;  %v5451_v15 = vld [vmem:[#allocation2 + $0x62c] ss:$16 sps:$4 sm:$0xff]  }
  0xd1   :  { %1574 = vmatprep.subr.bf16.mxu0 %v5356_v16  ;;  %1738 = vmatprep.subr.bf16.mxu1 %v5359_v17  ;;  %v5446_v16 = vld [vmem:[#allocation2 + $0x620] ss:$16 sps:$4 sm:$0xff]   ;;  %v5449_v17 = vld [vmem:[#allocation2 + $0x628] ss:$16 sps:$4 sm:$0xff]  }
  0xd4   :  { %1575 = vmatpush1.bf16.msra.mxu0 %v5354_v18  ;;  %1739 = vmatpush1.bf16.msra.mxu1 %v5357_v19  ;;  %v5454_v18 = vld [vmem:[#allocation2 + $0x644] ss:$16 sps:$4 sm:$0xff]   ;;  %v5457_v19 = vld [vmem:[#allocation2 + $0x64c] ss:$16 sps:$4 sm:$0xff]  }
  0xd5   :  { %1576 = vmatprep.subr.bf16.mxu0 %v5362_v20  ;;  %1740 = vmatprep.subr.bf16.mxu1 %v5365_v21  ;;  %v5452_v20 = vld [vmem:[#allocation2 + $0x640] ss:$16 sps:$4 sm:$0xff]   ;;  %v5455_v21 = vld [vmem:[#allocation2 + $0x648] ss:$16 sps:$4 sm:$0xff]  }
  0xd8   :  { %1577 = vmatpush1.bf16.msra.mxu0 %v5360_v22  ;;  %1741 = vmatpush1.bf16.msra.mxu1 %v5363_v23  ;;  %v6087_v22 = vmov 0   ;;  %v5463_v23 = vld [vmem:[#allocation2 + $0x66c] ss:$16 sps:$4 sm:$0xff]  }
  0xd9   :  { %1578 = vmatprep.subr.bf16.mxu0 %v5368_v24  ;;  %1742 = vmatprep.subr.bf16.mxu1 %v5371_v25  ;;  %v5458_v24 = vld [vmem:[#allocation2 + $0x660] ss:$16 sps:$4 sm:$0xff]   ;;  %v5461_v25 = vld [vmem:[#allocation2 + $0x668] ss:$16 sps:$4 sm:$0xff]  }
  0xdc   :  { %1579 = vmatpush1.bf16.msra.mxu0 %v5366_v26  ;;  %1743 = vmatpush1.bf16.msra.mxu1 %v5369_v27  ;;  %v5466_v26 = vld [vmem:[#allocation2 + $0x684] ss:$16 sps:$4 sm:$0xff]   ;;  %v5469_v27 = vld [vmem:[#allocation2 + $0x68c] ss:$16 sps:$4 sm:$0xff]  }
  0xdd   :  { %1580 = vmatprep.subr.bf16.mxu0 %v5374_v28  ;;  %1744 = vmatprep.subr.bf16.mxu1 %v5377_v29  ;;  %v5464_v28 = vld [vmem:[#allocation2 + $0x680] ss:$16 sps:$4 sm:$0xff]   ;;  %v5467_v29 = vld [vmem:[#allocation2 + $0x688] ss:$16 sps:$4 sm:$0xff]  }
  0xe0   :  { %1581 = vmatpush1.bf16.msra.mxu0 %v5372_v30  ;;  %1745 = vmatpush1.bf16.msra.mxu1 %v5375_v31  ;;  %v5472_v30 = vld [vmem:[#allocation2 + $0x6a4] ss:$16 sps:$4 sm:$0xff]   ;;  %v5475_v31 = vld [vmem:[#allocation2 + $0x6ac] ss:$16 sps:$4 sm:$0xff]  }
  0xe1   :  { %1582 = vmatprep.subr.bf16.mxu0 %v5380_v32  ;;  %1746 = vmatprep.subr.bf16.mxu1 %v5383_v33  ;;  %v5470_v32 = vld [vmem:[#allocation2 + $0x6a0] ss:$16 sps:$4 sm:$0xff]   ;;  %v5473_v33 = vld [vmem:[#allocation2 + $0x6a8] ss:$16 sps:$4 sm:$0xff]  }
  0xe4   :  { %1583 = vmatpush1.bf16.msra.mxu0 %v5378_v34  ;;  %1747 = vmatpush1.bf16.msra.mxu1 %v5381_v35  ;;  %v5478_v34 = vld [vmem:[#allocation2 + $0x6c4] ss:$16 sps:$4 sm:$0xff]   ;;  %v5481_v35 = vld [vmem:[#allocation2 + $0x6cc] ss:$16 sps:$4 sm:$0xff]  }
  0xe5   :  { %1584 = vmatprep.subr.bf16.mxu0 %v5386_v36  ;;  %1748 = vmatprep.subr.bf16.mxu1 %v5389_v37  ;;  %v5476_v36 = vld [vmem:[#allocation2 + $0x6c0] ss:$16 sps:$4 sm:$0xff]   ;;  %v5479_v37 = vld [vmem:[#allocation2 + $0x6c8] ss:$16 sps:$4 sm:$0xff]  }
  0xe8   :  { %1585 = vmatpush1.bf16.msra.mxu0 %v5384_v38  ;;  %1749 = vmatpush1.bf16.msra.mxu1 %v5387_v39  ;;  %v5484_v38 = vld [vmem:[#allocation2 + $0x6e4] ss:$16 sps:$4 sm:$0xff]   ;;  %v5487_v39 = vld [vmem:[#allocation2 + $0x6ec] ss:$16 sps:$4 sm:$0xff]  }
  0xe9   :  { %1586 = vmatprep.subr.bf16.mxu0 %v5392_v40  ;;  %1750 = vmatprep.subr.bf16.mxu1 %v5395_v41  ;;  %v5482_v40 = vld [vmem:[#allocation2 + $0x6e0] ss:$16 sps:$4 sm:$0xff]   ;;  %v5485_v41 = vld [vmem:[#allocation2 + $0x6e8] ss:$16 sps:$4 sm:$0xff]  }
  0xec   :  { %1587 = vmatpush1.bf16.msra.mxu0 %v5390_v42  ;;  %1751 = vmatpush1.bf16.msra.mxu1 %v5393_v43  ;;  %v5491_v42 = vld [vmem:[#allocation4 + $0x4] ss:$8 sps:$4 sm:$0xff]   ;;  %v5488_v43 = vld [vmem:[%s6346_s0 + $0x18] ss:$0 sps:$4 sm:$0xff]  }
  0xed   :  { %1588 = vmatprep.subr.bf16.mxu0 %v5398_v44  ;;  %1752 = vmatprep.subr.bf16.mxu1 %v5401_v45  ;;  %v5489_v44 = vld [vmem:[#allocation4] ss:$8 sps:$4 sm:$0xff]   ;;  %v5494_v45 = vld [vmem:[#allocation4 + $0x14] ss:$8 sps:$4 sm:$0xff]  }
  0xf0   :  { %1589 = vmatpush1.bf16.msra.mxu0 %v5396_v46  ;;  %1753 = vmatpush1.bf16.msra.mxu1 %v5399_v47  ;;  %v5492_v46 = vld [vmem:[#allocation4 + $0x10] ss:$8 sps:$4 sm:$0xff]   ;;  %v5497_v47 = vld [vmem:[#allocation4 + $0x24] ss:$8 sps:$4 sm:$0xff]  }
  0xf1   :  { %1590 = vmatprep.subr.bf16.mxu0 %v5404_v48  ;;  %1754 = vmatprep.subr.bf16.mxu1 %v5407_v49  ;;  %v5495_v48 = vld [vmem:[#allocation4 + $0x20] ss:$8 sps:$4 sm:$0xff]   ;;  %v5500_v49 = vld [vmem:[#allocation4 + $0x34] ss:$8 sps:$4 sm:$0xff]  }
  0xf4   :  { %1591 = vmatpush1.bf16.msra.mxu0 %v5402_v50  ;;  %1755 = vmatpush1.bf16.msra.mxu1 %v5405_v51  ;;  %v5498_v50 = vld [vmem:[#allocation4 + $0x30] ss:$8 sps:$4 sm:$0xff]   ;;  %v5503_v51 = vld [vmem:[#allocation4 + $0x44] ss:$8 sps:$4 sm:$0xff]  }
  0xf5   :  { %1592 = vmatprep.subr.bf16.mxu0 %v5410_v52  ;;  %1756 = vmatprep.subr.bf16.mxu1 %v5413_v53  ;;  %v5501_v52 = vld [vmem:[#allocation4 + $0x40] ss:$8 sps:$4 sm:$0xff]   ;;  %v5506_v53 = vld [vmem:[#allocation4 + $0x54] ss:$8 sps:$4 sm:$0xff]  }
  0xf8   :  { %1593 = vmatpush1.bf16.msra.mxu0 %v5408_v54  ;;  %1757 = vmatpush1.bf16.msra.mxu1 %v5411_v55  ;;  %v5504_v54 = vld [vmem:[#allocation4 + $0x50] ss:$8 sps:$4 sm:$0xff]   ;;  %v5509_v55 = vld [vmem:[#allocation4 + $0x64] ss:$8 sps:$4 sm:$0xff]  }
  0xf9   :  { %1594 = vmatprep.subr.bf16.mxu0 %v5416_v56  ;;  %1758 = vmatprep.subr.bf16.mxu1 %v5419_v57  ;;  %v5507_v56 = vld [vmem:[#allocation4 + $0x60] ss:$8 sps:$4 sm:$0xff]   ;;  %v5512_v57 = vld [vmem:[#allocation4 + $0x74] ss:$8 sps:$4 sm:$0xff]  }
  0xfc   :  { %1595 = vmatpush1.bf16.msra.mxu0 %v5414_v58  ;;  %1759 = vmatpush1.bf16.msra.mxu1 %v5417_v59  ;;  %v5510_v58 = vld [vmem:[#allocation4 + $0x70] ss:$8 sps:$4 sm:$0xff]   ;;  %v5515_v59 = vld [vmem:[#allocation4 + $0x84] ss:$8 sps:$4 sm:$0xff]  }
  0xfd   :  { %1596 = vmatprep.subr.bf16.mxu0 %v5422_v60  ;;  %1760 = vmatprep.subr.bf16.mxu1 %v5425_v61  ;;  %v5513_v60 = vld [vmem:[#allocation4 + $0x80] ss:$8 sps:$4 sm:$0xff]   ;;  %v5518_v61 = vld [vmem:[#allocation4 + $0x94] ss:$8 sps:$4 sm:$0xff]  }
 0x100   :  { %1597 = vmatpush1.bf16.msra.mxu0 %v5420_v62  ;;  %1761 = vmatpush1.bf16.msra.mxu1 %v5423_v63  ;;  %v5516_v62 = vld [vmem:[#allocation4 + $0x90] ss:$8 sps:$4 sm:$0xff]   ;;  %v5521_v63 = vld [vmem:[#allocation4 + $0xa4] ss:$8 sps:$4 sm:$0xff]  }
 0x101   :  { %1598 = vmatprep.subr.bf16.mxu0 %v5428_v0  ;;  %1762 = vmatprep.subr.bf16.mxu1 %v5431_v1  ;;  %v5519_v0 = vld [vmem:[#allocation4 + $0xa0] ss:$8 sps:$4 sm:$0xff]   ;;  %v5524_v1 = vld [vmem:[#allocation4 + $0xb4] ss:$8 sps:$4 sm:$0xff]  }
 0x104   :  { %1599 = vmatpush1.bf16.msra.mxu0 %v5426_v2  ;;  %1763 = vmatpush1.bf16.msra.mxu1 %v5429_v3  ;;  %v5522_v2 = vld [vmem:[#allocation4 + $0xb0] ss:$8 sps:$4 sm:$0xff]   ;;  %v5527_v3 = vld [vmem:[#allocation4 + $0xc4] ss:$8 sps:$4 sm:$0xff]  }
 0x105   :  { %1600 = vmatprep.subr.bf16.mxu0 %v5434_v4  ;;  %1764 = vmatprep.subr.bf16.mxu1 %v5437_v5  ;;  %v5525_v4 = vld [vmem:[#allocation4 + $0xc0] ss:$8 sps:$4 sm:$0xff]   ;;  %v5530_v5 = vld [vmem:[#allocation4 + $0xd4] ss:$8 sps:$4 sm:$0xff]  }
 0x108   :  { %1601 = vmatpush1.bf16.msra.mxu0 %v5432_v6  ;;  %1765 = vmatpush1.bf16.msra.mxu1 %v5435_v7  ;;  %v5528_v6 = vld [vmem:[#allocation4 + $0xd0] ss:$8 sps:$4 sm:$0xff]   ;;  %v5533_v7 = vld [vmem:[#allocation4 + $0xe4] ss:$8 sps:$4 sm:$0xff]  }
 0x109   :  { %1611 = vmatprep.subr.bf16.mxu0 %v5442_v8  ;;  %1775 = vmatprep.subr.bf16.mxu1 %v5445_v9  ;;  %v5531_v8 = vld [vmem:[#allocation4 + $0xe0] ss:$8 sps:$4 sm:$0xff]   ;;  %v5536_v9 = vld [vmem:[#allocation4 + $0xf4] ss:$8 sps:$4 sm:$0xff]  }
 0x10b   :  { %1603 = vmatmul.mubr.bf16.vlgmr.msra.gmra.mrb[0].mxu0 %v4477_v13  ;;  %1767 = vmatmul.mubr.bf16.vlgmr.msra.gmra.mrb[0].mxu1 %v4477_v13  ;;  %v5585_v13 = vld [vmem:[#allocation6] ss:$16 sps:$4 sm:$0xff]  }
 0x10c   :  { %1612 = vmatpush1.bf16.msra.mxu0 %v5440_v10  ;;  %1776 = vmatpush1.bf16.msra.mxu1 %v5443_v12  ;;  %v5534_v10 = vld [vmem:[#allocation4 + $0xf0] ss:$8 sps:$4 sm:$0xff]   ;;  %v5539_v12 = vld [vmem:[#allocation4 + $0x104] ss:$8 sps:$4 sm:$0xff]  }
 0x10d   :  { %1613 = vmatprep.subr.bf16.mxu0 %v5448_v14  ;;  %1777 = vmatprep.subr.bf16.mxu1 %v5451_v15  ;;  %v5587_v14 = vld [vmem:[#allocation6 + $0x4] ss:$16 sps:$4 sm:$0xff]  }
 0x10e   :  { %1643 = vmatprep.mubr.bf16.mxu0 %v6087_v22  ;;  %1807 = vmatprep.mubr.bf16.mxu1 %v6087_v22  ;;  %v5590_v15 = vld [vmem:[#allocation6 + $0x24] ss:$16 sps:$4 sm:$0xff]  }
 0x110   :  { %1614 = vmatpush1.bf16.msra.mxu0 %v5446_v16  ;;  %1778 = vmatpush1.bf16.msra.mxu1 %v5449_v17  ;;  %v5588_v16 = vld [vmem:[#allocation6 + $0x20] ss:$16 sps:$4 sm:$0xff]   ;;  %v323_v17 = vlaneseq }
 0x111   :  { %1615 = vmatprep.subr.bf16.mxu0 %v5454_v18  ;;  %1779 = vmatprep.subr.bf16.mxu1 %v5457_v19 }
 0x112   :  { %v6230_v18 = vshrl.u32 %v323_v17, 7  ;;  %v5591_v17 = vld [vmem:[#allocation6 + $0x40] ss:$16 sps:$4 sm:$0xff]  }
 0x114   :  { %1616 = vmatpush1.bf16.msra.mxu0 %v5452_v20  ;;  %1780 = vmatpush1.bf16.msra.mxu1 %v5455_v21  ;;  %v6233_v19 = vsub.s32 0, %v6230_v18  ;;  %v6238_v20 = vld [vmem:[%s6348_s2] sm:$0xf]  ;;  %v6241_v21 = vsub.s32 1, %v6230_v18 }
 0x115   :  { %1617 = vmatprep.subr.bf16.mxu0 %v5460_v11  ;;  %1781 = vmatprep.subr.bf16.mxu1 %v5463_v23  ;;  %v6244_v11 = vsub.s32 3, %v6230_v18 }
 0x116   :  { %v326_v23 = vrot.slane %v6238_v20, %v6233_v19 }
 0x118   :  { %1618 = vmatpush1.bf16.msra.mxu0 %v5458_v24  ;;  %1782 = vmatpush1.bf16.msra.mxu1 %v5461_v25  ;;  %v330_v24 = vrot.slane %v6238_v20, %v6241_v21  ;;  %v338_v25 = vrot.slane %v6238_v20, %v6244_v11 }
 0x119   :  { %1619 = vmatprep.subr.bf16.mxu0 %v5466_v26  ;;  %1783 = vmatprep.subr.bf16.mxu1 %v5469_v27 }
 0x11c   :  { %1620 = vmatpush1.bf16.msra.mxu0 %v5464_v28  ;;  %1784 = vmatpush1.bf16.msra.mxu1 %v5467_v29 }
 0x11d   :  { %1621 = vmatprep.subr.bf16.mxu0 %v5472_v30  ;;  %1785 = vmatprep.subr.bf16.mxu1 %v5475_v31 }
 0x120   :  { %1622 = vmatpush1.bf16.msra.mxu0 %v5470_v32  ;;  %1786 = vmatpush1.bf16.msra.mxu1 %v5473_v33 }
 0x121   :  { %1623 = vmatprep.subr.bf16.mxu0 %v5478_v34  ;;  %1787 = vmatprep.subr.bf16.mxu1 %v5481_v35 }
 0x124   :  { %1624 = vmatpush1.bf16.msra.mxu0 %v5476_v36  ;;  %1788 = vmatpush1.bf16.msra.mxu1 %v5479_v37 }
 0x125   :  { %1625 = vmatprep.subr.bf16.mxu0 %v5484_v38  ;;  %1789 = vmatprep.subr.bf16.mxu1 %v5487_v39 }
 0x128   :  { %1626 = vmatpush1.bf16.msra.mxu0 %v5482_v40  ;;  %1790 = vmatpush1.bf16.msra.mxu1 %v5485_v41  ;;  %v5537_v41 = vld [vmem:[#allocation4 + $0x100] ss:$8 sps:$4 sm:$0xff]  }
 0x129   :  { %2220 = vmatprep.subr.bf16.mxu0 %v5491_v42  ;;  %2524 = vmatprep.subr.bf16.mxu1 %v5587_v14 }
 0x12b   :  { %1644 = vmatmul.mubr.bf16.vlgmr.msra.gmra.mrb[0].mxu0 %v5488_v43  ;;  %1808 = vmatmul.mubr.bf16.vlgmr.msra.gmra.mrb[0].mxu1 %v5488_v43  ;;  %v5542_v43 = vld [vmem:[#allocation4 + $0x114] ss:$8 sps:$4 sm:$0xff]  }
 0x12c   :  { %2221 = vmatpush1.bf16.msra.mxu0 %v5489_v44  ;;  %2556 = vmatprep.mubr.bf16.mxu1 %v6087_v22 }
 0x12d   :  { %2222 = vmatprep.subr.bf16.mxu0 %v5494_v45  ;;  %2525 = vmatpush1.bf16.msra.mxu1 %v5585_v13  ;;  %v5540_v45 = vld [vmem:[#allocation4 + $0x110] ss:$8 sps:$4 sm:$0xff]  }
 0x12e   :  { %2526 = vmatprep.subr.bf16.mxu1 %v5590_v15  ;;  %v5582_v13 = vld [vmem:[#allocation4 + $0x1f0] ss:$8 sps:$4 sm:$0xff]  }
 0x130   :  { %2223 = vmatpush1.bf16.msra.mxu0 %v5492_v46  ;;  %v5545_v46 = vld [vmem:[#allocation4 + $0x124] ss:$8 sps:$4 sm:$0xff]  }
 0x131   :  { %2224 = vmatprep.subr.bf16.mxu0 %v5497_v47  ;;  %2527 = vmatpush1.bf16.msra.mxu1 %v5588_v16  ;;  %v5543_v47 = vld [vmem:[#allocation4 + $0x120] ss:$8 sps:$4 sm:$0xff]   ;;  %v5593_v16 = vld [vmem:[#allocation6 + $0x44] ss:$16 sps:$4 sm:$0xff]  }
 0x132   :  { %2528 = vmatprep.subr.bf16.mxu1 %v5593_v16 }
 0x134   :  { %2225 = vmatpush1.bf16.msra.mxu0 %v5495_v48  ;;  %v5548_v48 = vld [vmem:[#allocation4 + $0x134] ss:$8 sps:$4 sm:$0xff]  }
 0x135   :  { %2226 = vmatprep.subr.bf16.mxu0 %v5500_v49  ;;  %v5546_v49 = vld [vmem:[#allocation4 + $0x130] ss:$8 sps:$4 sm:$0xff]   ;;  %2529 = vmatpush1.bf16.msra.mxu1 %v5591_v17  ;;  %v5614_v17 = vld [vmem:[#allocation6 + $0x2c] ss:$16 sps:$4 sm:$0xff]  }
 0x138   :  { %2227 = vmatpush1.bf16.msra.mxu0 %v5498_v50  ;;  %v5551_v50 = vld [vmem:[#allocation4 + $0x144] ss:$8 sps:$4 sm:$0xff]  }
 0x139   :  { %2228 = vmatprep.subr.bf16.mxu0 %v5503_v51  ;;  %v5549_v51 = vld [vmem:[#allocation4 + $0x140] ss:$8 sps:$4 sm:$0xff]  }
 0x13c   :  { %2229 = vmatpush1.bf16.msra.mxu0 %v5501_v52  ;;  %v5554_v52 = vld [vmem:[#allocation4 + $0x154] ss:$8 sps:$4 sm:$0xff]  }
 0x13d   :  { %2230 = vmatprep.subr.bf16.mxu0 %v5506_v53  ;;  %v5552_v53 = vld [vmem:[#allocation4 + $0x150] ss:$8 sps:$4 sm:$0xff]  }
 0x140   :  { %2231 = vmatpush1.bf16.msra.mxu0 %v5504_v54  ;;  %v5557_v54 = vld [vmem:[#allocation4 + $0x164] ss:$8 sps:$4 sm:$0xff]  }
 0x141   :  { %2232 = vmatprep.subr.bf16.mxu0 %v5509_v55  ;;  %v5555_v55 = vld [vmem:[#allocation4 + $0x160] ss:$8 sps:$4 sm:$0xff]  }
 0x144   :  { %2233 = vmatpush1.bf16.msra.mxu0 %v5507_v56  ;;  %v5560_v56 = vld [vmem:[#allocation4 + $0x174] ss:$8 sps:$4 sm:$0xff]  }
 0x145   :  { %2234 = vmatprep.subr.bf16.mxu0 %v5512_v57  ;;  %v5558_v57 = vld [vmem:[#allocation4 + $0x170] ss:$8 sps:$4 sm:$0xff]  }
 0x148   :  { %2235 = vmatpush1.bf16.msra.mxu0 %v5510_v58  ;;  %v5563_v58 = vld [vmem:[#allocation4 + $0x184] ss:$8 sps:$4 sm:$0xff]  }
 0x149   :  { %2236 = vmatprep.subr.bf16.mxu0 %v5515_v59  ;;  %v5561_v59 = vld [vmem:[#allocation4 + $0x180] ss:$8 sps:$4 sm:$0xff]  }
 0x14c   :  { %2237 = vmatpush1.bf16.msra.mxu0 %v5513_v60  ;;  %v5566_v60 = vld [vmem:[#allocation4 + $0x194] ss:$8 sps:$4 sm:$0xff]  }
 0x14d   :  { %2238 = vmatprep.subr.bf16.mxu0 %v5518_v61  ;;  %v5564_v61 = vld [vmem:[#allocation4 + $0x190] ss:$8 sps:$4 sm:$0xff]  }
 0x150   :  { %2239 = vmatpush1.bf16.msra.mxu0 %v5516_v62  ;;  %v5569_v62 = vld [vmem:[#allocation4 + $0x1a4] ss:$8 sps:$4 sm:$0xff]  }
 0x151   :  { %2240 = vmatprep.subr.bf16.mxu0 %v5521_v63  ;;  %v5567_v63 = vld [vmem:[#allocation4 + $0x1a0] ss:$8 sps:$4 sm:$0xff]  }
 0x154   :  { %2241 = vmatpush1.bf16.msra.mxu0 %v5519_v0  ;;  %v5572_v0 = vld [vmem:[#allocation4 + $0x1b4] ss:$8 sps:$4 sm:$0xff]  }
 0x155   :  { %2242 = vmatprep.subr.bf16.mxu0 %v5524_v1  ;;  %v5570_v1 = vld [vmem:[#allocation4 + $0x1b0] ss:$8 sps:$4 sm:$0xff]  }
 0x158   :  { %2243 = vmatpush1.bf16.msra.mxu0 %v5522_v2  ;;  %v5575_v2 = vld [vmem:[#allocation4 + $0x1c4] ss:$8 sps:$4 sm:$0xff]  }
 0x159   :  { %2244 = vmatprep.subr.bf16.mxu0 %v5527_v3  ;;  %v5573_v3 = vld [vmem:[#allocation4 + $0x1c0] ss:$8 sps:$4 sm:$0xff]  }
 0x15c   :  { %2245 = vmatpush1.bf16.msra.mxu0 %v5525_v4  ;;  %v6255_v4 = vsub.s32 2, %v6230_v18 }
 0x15d   :  { %2246 = vmatprep.subr.bf16.mxu0 %v5530_v5  ;;  %v5578_v5 = vld [vmem:[#allocation4 + $0x1d4] ss:$8 sps:$4 sm:$0xff]  }
 0x160   :  { %2247 = vmatpush1.bf16.msra.mxu0 %v5528_v6  ;;  %v5576_v6 = vld [vmem:[#allocation4 + $0x1d0] ss:$8 sps:$4 sm:$0xff]  }
 0x161   :  { %2248 = vmatprep.subr.bf16.mxu0 %v5533_v7  ;;  %v334_v7 = vrot.slane %v6238_v20, %v6255_v4  ;;  %v5596_v20 = vld [vmem:[#allocation6 + $0x64] ss:$16 sps:$4 sm:$0xff]  }
 0x162   :  { %2530 = vmatprep.subr.bf16.mxu1 %v5596_v20  ;;  %v5612_v20 = vld [vmem:[#allocation6 + $0x28] ss:$16 sps:$4 sm:$0xff]  }
 0x164   :  { %2249 = vmatpush1.bf16.msra.mxu0 %v5531_v8  ;;  %v5581_v8 = vld [vmem:[#allocation4 + $0x1e4] ss:$8 sps:$4 sm:$0xff]  }
 0x165   :  { %2250 = vmatprep.subr.bf16.mxu0 %v5536_v9  ;;  %v5579_v9 = vld [vmem:[#allocation4 + $0x1e0] ss:$8 sps:$4 sm:$0xff]  }
 0x168   :  { %2251 = vmatpush1.bf16.msra.mxu0 %v5534_v10 }
 0x169   :  { %2261 = vmatprep.subr.bf16.mxu0 %v5539_v12  ;;  %v5584_v12 = vld [vmem:[#allocation4 + $0x1f4] ss:$8 sps:$4 sm:$0xff]  }
 0x1fe   :  { %v1645_v26 = vpop.f32.mrb[0].mxu0  ;;  %v6252_v27 = vpop.f32.mrb[0].mxu1 }
 0x1ff   :  { %v5083_v28 = vadd.f32 %v1645_v26, %v326_v23  ;;  %v1647_v29 = vpop.f32.mrb[1].mxu0  ;;  %v1811_v30 = vpop.f32.mrb[1].mxu1  ;;  %v5085_v10 = vadd.f32 %v6252_v27, %v334_v7  ;;  %v5594_v23 = vld [vmem:[#allocation6 + $0x60] ss:$16 sps:$4 sm:$0xff]   ;;  %v5602_v26 = vld [vmem:[#allocation6 + $0xa4] ss:$16 sps:$4 sm:$0xff]  }
 0x200   :  { %v5084_v31 = vadd.f32 %v1647_v29, %v330_v24  ;;  %v5086_v32 = vadd.f32 %v1811_v30, %v338_v25  ;;  %v1649_v33 = vpop.f32.mrb[2].mxu0  ;;  %v1813_v34 = vpop.f32.mrb[2].mxu1  ;;  %2531 = vmatpush1.bf16.msra.mxu1 %v5594_v23  ;;  %v5599_v24 = vld [vmem:[#allocation6 + $0x84] ss:$16 sps:$4 sm:$0xff]   ;;  %v5597_v25 = vld [vmem:[#allocation6 + $0x80] ss:$16 sps:$4 sm:$0xff]  }
 0x201   :  { %v1816_v35 = vmax.f32 %v5083_v28, 0.0  ;;  %v1650_v36 = vpop.f32.mrb[3].mxu0  ;;  %v1814_v37 = vpop.f32.mrb[3].mxu1  ;;  %v1818_v14 = vmax.f32 %v5085_v10, 0.0  ;;  %2532 = vmatprep.subr.bf16.mxu1 %v5599_v24  ;;  %v5600_v27 = vld [vmem:[#allocation6 + $0xa0] ss:$16 sps:$4 sm:$0xff]  }
 0x202   :  { %v1817_v38 = vmax.f32 %v5084_v31, 0.0  ;;  %v1819_v39 = vmax.f32 %v5086_v32, 0.0  ;;  %v5605_v28 = vld [vmem:[#allocation6 + $0xc4] ss:$16 sps:$4 sm:$0xff]   ;;  %v5603_v29 = vld [vmem:[#allocation6 + $0xc0] ss:$16 sps:$4 sm:$0xff]  }
 0x203   :  { %v1820_v42 = vpack.c.bf16 %v1816_v35, %v1816_v35  ;;  %v1822_v15 = vpack.c.bf16 %v1818_v14, %v1818_v14  ;;  %v5608_v30 = vld [vmem:[#allocation6 + $0xe4] ss:$16 sps:$4 sm:$0xff]   ;;  %v5606_v31 = vld [vmem:[#allocation6 + $0xe0] ss:$16 sps:$4 sm:$0xff]   ;;  %v5611_v32 = vld [vmem:[#allocation6 + $0xc] ss:$16 sps:$4 sm:$0xff]  }
 0x204   :  { %v1821_v40 = vpack.c.bf16 %v1817_v38, %v1817_v38  ;;  %v1823_v44 = vpack.c.bf16 %v1819_v39, %v1819_v39  ;;  %2533 = vmatpush1.bf16.msra.mxu1 %v5597_v25  ;;  %v5636_v33 = vld [vmem:[#allocation7 + $0x8] ss:$28 sps:$4 sm:$0xff]   ;;  %v5642_v36 = vld [vmem:[#allocation7 + $0x40] ss:$28 sps:$4 sm:$0xff]   ;;  %v5648_v38 = vld [vmem:[#allocation7 + $0x78] ss:$28 sps:$4 sm:$0xff]  }
 0x205   :  { %2534 = vmatprep.subr.bf16.mxu1 %v5602_v26  ;;  %v5638_v34 = vld [vmem:[#allocation7 + $0xc] ss:$28 sps:$4 sm:$0xff]   ;;  %v5644_v35 = vld [vmem:[#allocation7 + $0x44] ss:$28 sps:$4 sm:$0xff]   ;;  %v5650_v37 = vld [vmem:[#allocation7 + $0x7c] ss:$28 sps:$4 sm:$0xff]  }
 0x206   :  { %2252 = vmatprep.mubr.bf16.mxu0 %v1821_v40  ;;  %v5656_v39 = vld [vmem:[#allocation7 + $0xb4] ss:$28 sps:$4 sm:$0xff]   ;;  %v5617_v23 = vld [vmem:[#allocation6 + $0x4c] ss:$16 sps:$4 sm:$0xff]   ;;  %v5615_v24 = vld [vmem:[#allocation6 + $0x48] ss:$16 sps:$4 sm:$0xff]  }
 0x207   :  { %2253 = vmatmul.mubr.bf16.vlgmr.msra.gmra.mrb[4].mxu0 %v1820_v42  ;;  %v5654_v40 = vld [vmem:[#allocation7 + $0xb0] ss:$28 sps:$4 sm:$0xff]   ;;  %v5660_v42 = vld [vmem:[#allocation7 + $0xe8] ss:$28 sps:$4 sm:$0xff]  }
 0x208   :  { %2262 = vmatpush1.bf16.msra.mxu0 %v5537_v41  ;;  %2293 = vmatprep.mubr.bf16.mxu0 %v1823_v44  ;;  %v5662_v41 = vld [vmem:[#allocation7 + $0xec] ss:$28 sps:$4 sm:$0xff]   ;;  %v5666_v44 = vld [vmem:[#allocation7 + $0x120] ss:$28 sps:$4 sm:$0xff]  }
 0x209   :  { %2263 = vmatprep.subr.bf16.mxu0 %v5542_v43  ;;  %2535 = vmatpush1.bf16.msra.mxu1 %v5600_v27  ;;  %v5668_v43 = vld [vmem:[#allocation7 + $0x124] ss:$28 sps:$4 sm:$0xff]   ;;  %v5620_v25 = vld [vmem:[#allocation6 + $0x6c] ss:$16 sps:$4 sm:$0xff]   ;;  %v5618_v26 = vld [vmem:[#allocation6 + $0x68] ss:$16 sps:$4 sm:$0xff]  }
 0x20a   :  { %2536 = vmatprep.subr.bf16.mxu1 %v5605_v28  ;;  %v5623_v27 = vld [vmem:[#allocation6 + $0x8c] ss:$16 sps:$4 sm:$0xff]   ;;  %v5621_v28 = vld [vmem:[#allocation6 + $0x88] ss:$16 sps:$4 sm:$0xff]  }
 0x20c   :  { %2264 = vmatpush1.bf16.msra.mxu0 %v5540_v45  ;;  %v5674_v45 = vld [vmem:[#allocation7 + $0x15c] ss:$28 sps:$4 sm:$0xff]  }
 0x20d   :  { %2265 = vmatprep.subr.bf16.mxu0 %v5545_v46  ;;  %2537 = vmatpush1.bf16.msra.mxu1 %v5603_v29  ;;  %v5672_v46 = vld [vmem:[#allocation7 + $0x158] ss:$28 sps:$4 sm:$0xff]   ;;  %v5626_v29 = vld [vmem:[#allocation6 + $0xac] ss:$16 sps:$4 sm:$0xff]  }
 0x20e   :  { %2538 = vmatprep.subr.bf16.mxu1 %v5608_v30  ;;  %v5624_v30 = vld [vmem:[#allocation6 + $0xa8] ss:$16 sps:$4 sm:$0xff]  }
 0x210   :  { %2266 = vmatpush1.bf16.msra.mxu0 %v5543_v47  ;;  %v5680_v47 = vld [vmem:[#allocation7 + $0x194] ss:$28 sps:$4 sm:$0xff]  }
 0x211   :  { %2267 = vmatprep.subr.bf16.mxu0 %v5548_v48  ;;  %2539 = vmatpush1.bf16.msra.mxu1 %v5606_v31  ;;  %v5678_v48 = vld [vmem:[#allocation7 + $0x190] ss:$28 sps:$4 sm:$0xff]  }
 0x212   :  { %2565 = vmatprep.subr.bf16.mxu1 %v5611_v32  ;;  %v5629_v31 = vld [vmem:[#allocation6 + $0xcc] ss:$16 sps:$4 sm:$0xff]  }
 0x213   :  { %v5632_v32 = vld [vmem:[#allocation6 + $0xec] ss:$16 sps:$4 sm:$0xff]  }
 0x214   :  { %2268 = vmatpush1.bf16.msra.mxu0 %v5546_v49  ;;  %v5686_v49 = vld [vmem:[#allocation7 + $0x1cc] ss:$28 sps:$4 sm:$0xff]  }
 0x215   :  { %2269 = vmatprep.subr.bf16.mxu0 %v5551_v50  ;;  %v5684_v50 = vld [vmem:[#allocation7 + $0x1c8] ss:$28 sps:$4 sm:$0xff]  }
 0x218   :  { %2270 = vmatpush1.bf16.msra.mxu0 %v5549_v51  ;;  %v5692_v51 = vld [vmem:[#allocation7 + $0x204] ss:$28 sps:$4 sm:$0xff]  }
 0x219   :  { %2271 = vmatprep.subr.bf16.mxu0 %v5554_v52  ;;  %v5690_v52 = vld [vmem:[#allocation7 + $0x200] ss:$28 sps:$4 sm:$0xff]  }
 0x21c   :  { %2272 = vmatpush1.bf16.msra.mxu0 %v5552_v53  ;;  %v5698_v53 = vld [vmem:[#allocation7 + $0x23c] ss:$28 sps:$4 sm:$0xff]  }
 0x21d   :  { %2273 = vmatprep.subr.bf16.mxu0 %v5557_v54  ;;  %v5696_v54 = vld [vmem:[#allocation7 + $0x238] ss:$28 sps:$4 sm:$0xff]  }
 0x220   :  { %2274 = vmatpush1.bf16.msra.mxu0 %v5555_v55  ;;  %v5704_v55 = vld [vmem:[#allocation7 + $0x274] ss:$28 sps:$4 sm:$0xff]  }
 0x221   :  { %2275 = vmatprep.subr.bf16.mxu0 %v5560_v56  ;;  %v5702_v56 = vld [vmem:[#allocation7 + $0x270] ss:$28 sps:$4 sm:$0xff]  }
 0x224   :  { %2276 = vmatpush1.bf16.msra.mxu0 %v5558_v57  ;;  %v5710_v57 = vld [vmem:[#allocation7 + $0x2ac] ss:$28 sps:$4 sm:$0xff]  }
 0x225   :  { %2277 = vmatprep.subr.bf16.mxu0 %v5563_v58  ;;  %v5708_v58 = vld [vmem:[#allocation7 + $0x2a8] ss:$28 sps:$4 sm:$0xff]  }
 0x228   :  { %2278 = vmatpush1.bf16.msra.mxu0 %v5561_v59  ;;  %v5716_v59 = vld [vmem:[#allocation7 + $0x2e4] ss:$28 sps:$4 sm:$0xff]  }
 0x229   :  { %2279 = vmatprep.subr.bf16.mxu0 %v5566_v60  ;;  %v5714_v60 = vld [vmem:[#allocation7 + $0x2e0] ss:$28 sps:$4 sm:$0xff]  }
 0x22c   :  { %2280 = vmatpush1.bf16.msra.mxu0 %v5564_v61  ;;  %v1888_v61 = vld [vmem:[%s6350_s4] sm:$0x3] }
 0x22d   :  { %2281 = vmatprep.subr.bf16.mxu0 %v5569_v62  ;;  %v1893_v62 = vrot.slane %v1888_v61, %v6233_v19 }
 0x230   :  { %2282 = vmatpush1.bf16.msra.mxu0 %v5567_v63  ;;  %v1897_v63 = vrot.slane %v1888_v61, %v6241_v21  ;;  %v5711_v61 = vld [vmem:[#allocation7 + $0x2d8] ss:$28 sps:$4 sm:$0xff]  }
 0x231   :  { %2283 = vmatprep.subr.bf16.mxu0 %v5572_v0 }
 0x234   :  { %2284 = vmatpush1.bf16.msra.mxu0 %v5570_v1 }
 0x235   :  { %2285 = vmatprep.subr.bf16.mxu0 %v5575_v2 }
 0x238   :  { %2286 = vmatpush1.bf16.msra.mxu0 %v5573_v3 }
 0x239   :  { %2287 = vmatprep.subr.bf16.mxu0 %v5578_v5 }
 0x23c   :  { %2288 = vmatpush1.bf16.msra.mxu0 %v5576_v6 }
 0x23d   :  { %2289 = vmatprep.subr.bf16.mxu0 %v5581_v8 }
 0x240   :  { %2290 = vmatpush1.bf16.msra.mxu0 %v5579_v9  ;;  %v2305_v9 = vld [vmem:[%s6355_s9] sm:$0xf] }
 0x241   :  { %2291 = vmatprep.subr.bf16.mxu0 %v5584_v12  ;;  %v2306_v10 = vunpack.c.l.bf16 %v2305_v9  ;;  %v6278_v9 = vld [vmem:[%s6352_s6] sm:$0xf] }
 0x244   :  { %2292 = vmatpush1.bf16.msra.mxu0 %v5582_v13 }
 0x245   :  { %4141 = vmatprep.subr.bf16.mxu0 %v5638_v34  ;;  %v5635_v34 = vld [vmem:[#allocation7 + $0x4] ss:$28 sps:$4 sm:$0xff]  }
 0x247   :  { %2294 = vmatmul.mubr.bf16.vlgmr.msra.gmra.mrb[4].mxu0 %v1822_v15  ;;  %v5609_v15 = vld [vmem:[#allocation6 + $0x8] ss:$16 sps:$4 sm:$0xff]  }
 0x248   :  { %4142 = vmatpush1.bf16.msra.mxu0 %v5636_v33  ;;  %v5630_v33 = vld [vmem:[#allocation6 + $0xe8] ss:$16 sps:$4 sm:$0xff]  }
 0x249   :  { %4143 = vmatprep.subr.bf16.mxu0 %v5644_v35  ;;  %v5633_v35 = vld [vmem:[#allocation7] ss:$28 sps:$4 sm:$0xff]  }
 0x24c   :  { %4144 = vmatpush1.bf16.msra.mxu0 %v5642_v36  ;;  %v5641_v36 = vld [vmem:[#allocation7 + $0x3c] ss:$28 sps:$4 sm:$0xff]  }
 0x24d   :  { %4145 = vmatprep.subr.bf16.mxu0 %v5650_v37  ;;  %v5639_v37 = vld [vmem:[#allocation7 + $0x38] ss:$28 sps:$4 sm:$0xff]  }
 0x250   :  { %4146 = vmatpush1.bf16.msra.mxu0 %v5648_v38  ;;  %v5647_v38 = vld [vmem:[#allocation7 + $0x74] ss:$28 sps:$4 sm:$0xff]  }
 0x251   :  { %4147 = vmatprep.subr.bf16.mxu0 %v5656_v39  ;;  %v5645_v39 = vld [vmem:[#allocation7 + $0x70] ss:$28 sps:$4 sm:$0xff]  }
 0x254   :  { %4148 = vmatpush1.bf16.msra.mxu0 %v5654_v40  ;;  %v5653_v40 = vld [vmem:[#allocation7 + $0xac] ss:$28 sps:$4 sm:$0xff]  }
 0x255   :  { %4149 = vmatprep.subr.bf16.mxu0 %v5662_v41  ;;  %v5651_v41 = vld [vmem:[#allocation7 + $0xa8] ss:$28 sps:$4 sm:$0xff]  }
 0x258   :  { %4150 = vmatpush1.bf16.msra.mxu0 %v5660_v42  ;;  %v5659_v42 = vld [vmem:[#allocation7 + $0xe4] ss:$28 sps:$4 sm:$0xff]  }
 0x259   :  { %4151 = vmatprep.subr.bf16.mxu0 %v5668_v43  ;;  %v5657_v43 = vld [vmem:[#allocation7 + $0xe0] ss:$28 sps:$4 sm:$0xff]  }
 0x25c   :  { %4152 = vmatpush1.bf16.msra.mxu0 %v5666_v44  ;;  %v5665_v44 = vld [vmem:[#allocation7 + $0x11c] ss:$28 sps:$4 sm:$0xff]  }
 0x25d   :  { %4153 = vmatprep.subr.bf16.mxu0 %v5674_v45  ;;  %v5663_v45 = vld [vmem:[#allocation7 + $0x118] ss:$28 sps:$4 sm:$0xff]  }
 0x260   :  { %4154 = vmatpush1.bf16.msra.mxu0 %v5672_v46  ;;  %v5671_v46 = vld [vmem:[#allocation7 + $0x154] ss:$28 sps:$4 sm:$0xff]  }
 0x261   :  { %4155 = vmatprep.subr.bf16.mxu0 %v5680_v47  ;;  %v5669_v47 = vld [vmem:[#allocation7 + $0x150] ss:$28 sps:$4 sm:$0xff]  }
 0x264   :  { %4156 = vmatpush1.bf16.msra.mxu0 %v5678_v48  ;;  %v5677_v48 = vld [vmem:[#allocation7 + $0x18c] ss:$28 sps:$4 sm:$0xff]  }
 0x265   :  { %4157 = vmatprep.subr.bf16.mxu0 %v5686_v49  ;;  %v5675_v49 = vld [vmem:[#allocation7 + $0x188] ss:$28 sps:$4 sm:$0xff]  }
 0x268   :  { %4158 = vmatpush1.bf16.msra.mxu0 %v5684_v50  ;;  %v5683_v50 = vld [vmem:[#allocation7 + $0x1c4] ss:$28 sps:$4 sm:$0xff]  }
 0x269   :  { %4159 = vmatprep.subr.bf16.mxu0 %v5692_v51  ;;  %v5681_v51 = vld [vmem:[#allocation7 + $0x1c0] ss:$28 sps:$4 sm:$0xff]  }
 0x26c   :  { %4160 = vmatpush1.bf16.msra.mxu0 %v5690_v52  ;;  %v5689_v52 = vld [vmem:[#allocation7 + $0x1fc] ss:$28 sps:$4 sm:$0xff]  }
 0x26d   :  { %4161 = vmatprep.subr.bf16.mxu0 %v5698_v53  ;;  %v5687_v53 = vld [vmem:[#allocation7 + $0x1f8] ss:$28 sps:$4 sm:$0xff]  }
 0x270   :  { %4162 = vmatpush1.bf16.msra.mxu0 %v5696_v54  ;;  %v5695_v54 = vld [vmem:[#allocation7 + $0x234] ss:$28 sps:$4 sm:$0xff]  }
 0x271   :  { %4163 = vmatprep.subr.bf16.mxu0 %v5704_v55  ;;  %v5693_v55 = vld [vmem:[#allocation7 + $0x230] ss:$28 sps:$4 sm:$0xff]  }
 0x274   :  { %4164 = vmatpush1.bf16.msra.mxu0 %v5702_v56  ;;  %v5701_v56 = vld [vmem:[#allocation7 + $0x26c] ss:$28 sps:$4 sm:$0xff]  }
 0x275   :  { %4165 = vmatprep.subr.bf16.mxu0 %v5710_v57  ;;  %v5699_v57 = vld [vmem:[#allocation7 + $0x268] ss:$28 sps:$4 sm:$0xff]  }
 0x278   :  { %4166 = vmatpush1.bf16.msra.mxu0 %v5708_v58  ;;  %v5707_v58 = vld [vmem:[#allocation7 + $0x2a4] ss:$28 sps:$4 sm:$0xff]  }
 0x279   :  { %4167 = vmatprep.subr.bf16.mxu0 %v5716_v59  ;;  %v5705_v59 = vld [vmem:[#allocation7 + $0x2a0] ss:$28 sps:$4 sm:$0xff]  }
 0x27c   :  { %4168 = vmatpush1.bf16.msra.mxu0 %v5714_v60  ;;  %v5713_v60 = vld [vmem:[#allocation7 + $0x2dc] ss:$28 sps:$4 sm:$0xff]  }
 0x31a   :  { %v2295_v0 = vpop.f32.mrb[4].mxu0 }
 0x31b   :  { %v5087_v1 = vadd.f32 %v2295_v0, %v1893_v62  ;;  %v2297_v2 = vpop.f32.mrb[5].mxu0  ;;  %v5719_v62 = vld [vmem:[#allocation7 + $0x314] ss:$28 sps:$4 sm:$0xff]  }
 0x31c   :  { %v5088_v3 = vadd.f32 %v2297_v2, %v1897_v63  ;;  %v2299_v5 = vpop.f32.mrb[6].mxu0  ;;  %v5722_v63 = vld [vmem:[#allocation7 + $0x31c] ss:$28 sps:$4 sm:$0xff]   ;;  %v5725_v2 = vld [vmem:[#allocation7 + $0x34c] ss:$28 sps:$4 sm:$0xff]  }
 0x31d   :  { %4460 = vst [vmem:[%s6357_s11] sm:$0xff] %v5087_v1  ;;  %v2300_v6 = vpop.f32.mrb[7].mxu0  ;;  %v5720_v0 = vld [vmem:[#allocation7 + $0x318] ss:$28 sps:$4 sm:$0xff]   ;;  %4169 = vmatprep.subr.bf16.mxu0 %v5722_v63  ;;  %v5726_v5 = vld [vmem:[#allocation7 + $0x350] ss:$28 sps:$4 sm:$0xff]  }
 0x31e   :  { %v2302_v7 = vmul.f32 0.5, %v5088_v3  ;;  %4461 = vst [vmem:[%s6357_s11 + $0x8] sm:$0xff] %v5088_v3  ;;  %4170 = vmatpush1.bf16.msra.mxu0 %v5720_v0  ;;  %v5728_v3 = vld [vmem:[#allocation7 + $0x354] ss:$28 sps:$4 sm:$0xff]   ;;  %v5723_v6 = vld [vmem:[#allocation7 + $0x348] ss:$28 sps:$4 sm:$0xff]  }
 0x31f   :  { %4171 = vmatprep.subr.bf16.mxu0 %v5728_v3  ;;  %v5782_v63 = vld [vmem:[#allocation7 + $0x54c] ss:$28 sps:$4 sm:$0xff]  }
 0x320   :  { %v2303_v8 = vmul.f32 1.442695, %v2302_v7  ;;  %v5731_v7 = vld [vmem:[#allocation7 + $0x384] ss:$28 sps:$4 sm:$0xff]  }
 0x321   :  { %v5780_v3 = vld [vmem:[#allocation7 + $0x548] ss:$28 sps:$4 sm:$0xff]  }
 0x322   :  { %5953 = vpow2.f32 %v2303_v8  ;;  %4172 = vmatpush1.bf16.msra.mxu0 %v5726_v5  ;;  %v5734_v8 = vld [vmem:[#allocation7 + $0x38c] ss:$28 sps:$4 sm:$0xff]   ;;  %v5785_v5 = vld [vmem:[#allocation7 + $0x57c] ss:$28 sps:$4 sm:$0xff]  }
 0x323   :  { %4182 = vmatprep.subr.bf16.mxu0 %v5734_v8  ;;  %v5786_v8 = vld [vmem:[#allocation7 + $0x580] ss:$28 sps:$4 sm:$0xff]  }
 0x32c   :  { %v5954_v12 = vpop.eup %5953 }
 0x32d   :  { %v2307_v13 = vmul.f32 %v5954_v12, %v2306_v10  ;;  %v2347_v10 = vrot.slane %v6278_v9, %v6233_v19  ;;  %v2351_v12 = vrot.slane %v6278_v9, %v6241_v21 }
 0x32f   :  { %v2308_v14 = vadd.f32 %v5087_v1, %v2307_v13  ;;  %v5717_v1 = vld [vmem:[#allocation7 + $0x310] ss:$28 sps:$4 sm:$0xff]  }
 0x331   :  { %v2309_v16 = vpack.c.bf16 %v2308_v14, %v2308_v14 }
 0x333   :  { %2557 = vmatmul.mubr.bf16.vlgmr.msra.gmra.mrb[4].mxu1 %v2309_v16 }
 0x334   :  { %2566 = vmatpush1.bf16.msra.mxu1 %v5609_v15  ;;  %2597 = vmatprep.mubr.bf16.mxu1 %v6087_v22  ;;  %v5627_v22 = vld [vmem:[#allocation6 + $0xc8] ss:$16 sps:$4 sm:$0xff]  }
 0x335   :  { %2567 = vmatprep.subr.bf16.mxu1 %v5614_v17 }
 0x338   :  { %2568 = vmatpush1.bf16.msra.mxu1 %v5612_v20 }
 0x339   :  { %2569 = vmatprep.subr.bf16.mxu1 %v5617_v23 }
 0x33c   :  { %2570 = vmatpush1.bf16.msra.mxu1 %v5615_v24 }
 0x33d   :  { %2571 = vmatprep.subr.bf16.mxu1 %v5620_v25 }
 0x340   :  { %2572 = vmatpush1.bf16.msra.mxu1 %v5618_v26  ;;  %v5729_v26 = vld [vmem:[#allocation7 + $0x380] ss:$28 sps:$4 sm:$0xff]  }
 0x341   :  { %2573 = vmatprep.subr.bf16.mxu1 %v5623_v27  ;;  %v5732_v27 = vld [vmem:[#allocation7 + $0x388] ss:$28 sps:$4 sm:$0xff]  }
 0x344   :  { %2574 = vmatpush1.bf16.msra.mxu1 %v5621_v28 }
 0x345   :  { %2575 = vmatprep.subr.bf16.mxu1 %v5626_v29  ;;  %v5737_v29 = vld [vmem:[#allocation7 + $0x3bc] ss:$28 sps:$4 sm:$0xff]  }
 0x348   :  { %2576 = vmatpush1.bf16.msra.mxu1 %v5624_v30  ;;  %v5740_v30 = vld [vmem:[#allocation7 + $0x3c4] ss:$28 sps:$4 sm:$0xff]  }
 0x349   :  { %2577 = vmatprep.subr.bf16.mxu1 %v5629_v31  ;;  %v5735_v31 = vld [vmem:[#allocation7 + $0x3b8] ss:$28 sps:$4 sm:$0xff]  }
 0x34c   :  { %2578 = vmatpush1.bf16.msra.mxu1 %v5627_v22  ;;  %v5738_v22 = vld [vmem:[#allocation7 + $0x3c0] ss:$28 sps:$4 sm:$0xff]  }
 0x34d   :  { %2579 = vmatprep.subr.bf16.mxu1 %v5632_v32  ;;  %v5743_v32 = vld [vmem:[#allocation7 + $0x3f4] ss:$28 sps:$4 sm:$0xff]  }
 0x350   :  { %2580 = vmatpush1.bf16.msra.mxu1 %v5630_v33  ;;  %v5746_v33 = vld [vmem:[#allocation7 + $0x3fc] ss:$28 sps:$4 sm:$0xff]  }
 0x351   :  { %4059 = vmatprep.subr.bf16.mxu1 %v5635_v34  ;;  %v5741_v34 = vld [vmem:[#allocation7 + $0x3f0] ss:$28 sps:$4 sm:$0xff]  }
 0x353   :  { %2598 = vmatmul.mubr.bf16.vlgmr.msra.gmra.mrb[8].mxu1 %v2309_v16 }
 0x354   :  { %4060 = vmatpush1.bf16.msra.mxu1 %v5633_v35  ;;  %v5744_v35 = vld [vmem:[#allocation7 + $0x3f8] ss:$28 sps:$4 sm:$0xff]  }
 0x355   :  { %4061 = vmatprep.subr.bf16.mxu1 %v5641_v36  ;;  %v5749_v36 = vld [vmem:[#allocation7 + $0x42c] ss:$28 sps:$4 sm:$0xff]  }
 0x358   :  { %4062 = vmatpush1.bf16.msra.mxu1 %v5639_v37  ;;  %v5752_v37 = vld [vmem:[#allocation7 + $0x434] ss:$28 sps:$4 sm:$0xff]  }
 0x359   :  { %4063 = vmatprep.subr.bf16.mxu1 %v5647_v38  ;;  %v5747_v38 = vld [vmem:[#allocation7 + $0x428] ss:$28 sps:$4 sm:$0xff]  }
 0x35c   :  { %4064 = vmatpush1.bf16.msra.mxu1 %v5645_v39  ;;  %v5750_v39 = vld [vmem:[#allocation7 + $0x430] ss:$28 sps:$4 sm:$0xff]  }
 0x35d   :  { %4065 = vmatprep.subr.bf16.mxu1 %v5653_v40  ;;  %v5755_v40 = vld [vmem:[#allocation7 + $0x464] ss:$28 sps:$4 sm:$0xff]  }
 0x360   :  { %4066 = vmatpush1.bf16.msra.mxu1 %v5651_v41  ;;  %v5758_v41 = vld [vmem:[#allocation7 + $0x46c] ss:$28 sps:$4 sm:$0xff]  }
 0x361   :  { %4067 = vmatprep.subr.bf16.mxu1 %v5659_v42  ;;  %v5753_v42 = vld [vmem:[#allocation7 + $0x460] ss:$28 sps:$4 sm:$0xff]  }
 0x364   :  { %4068 = vmatpush1.bf16.msra.mxu1 %v5657_v43  ;;  %v5756_v43 = vld [vmem:[#allocation7 + $0x468] ss:$28 sps:$4 sm:$0xff]  }
 0x365   :  { %4069 = vmatprep.subr.bf16.mxu1 %v5665_v44  ;;  %v5761_v44 = vld [vmem:[#allocation7 + $0x49c] ss:$28 sps:$4 sm:$0xff]  }
 0x368   :  { %4070 = vmatpush1.bf16.msra.mxu1 %v5663_v45  ;;  %v5764_v45 = vld [vmem:[#allocation7 + $0x4a4] ss:$28 sps:$4 sm:$0xff]  }
 0x369   :  { %4071 = vmatprep.subr.bf16.mxu1 %v5671_v46  ;;  %v5759_v46 = vld [vmem:[#allocation7 + $0x498] ss:$28 sps:$4 sm:$0xff]  }
 0x36c   :  { %4072 = vmatpush1.bf16.msra.mxu1 %v5669_v47  ;;  %v5762_v47 = vld [vmem:[#allocation7 + $0x4a0] ss:$28 sps:$4 sm:$0xff]  }
 0x36d   :  { %4073 = vmatprep.subr.bf16.mxu1 %v5677_v48  ;;  %v5767_v48 = vld [vmem:[#allocation7 + $0x4d4] ss:$28 sps:$4 sm:$0xff]  }
 0x370   :  { %4074 = vmatpush1.bf16.msra.mxu1 %v5675_v49  ;;  %v5770_v49 = vld [vmem:[#allocation7 + $0x4dc] ss:$28 sps:$4 sm:$0xff]  }
 0x371   :  { %4075 = vmatprep.subr.bf16.mxu1 %v5683_v50  ;;  %v2359_v50 = vrot.slane %v6278_v9, %v6244_v11 }
 0x374   :  { %4076 = vmatpush1.bf16.msra.mxu1 %v5681_v51  ;;  %v5765_v51 = vld [vmem:[#allocation7 + $0x4d0] ss:$28 sps:$4 sm:$0xff]  }
 0x375   :  { %4077 = vmatprep.subr.bf16.mxu1 %v5689_v52  ;;  %v5768_v52 = vld [vmem:[#allocation7 + $0x4d8] ss:$28 sps:$4 sm:$0xff]  }
 0x378   :  { %4078 = vmatpush1.bf16.msra.mxu1 %v5687_v53  ;;  %v5773_v53 = vld [vmem:[#allocation7 + $0x50c] ss:$28 sps:$4 sm:$0xff]  }
 0x379   :  { %4079 = vmatprep.subr.bf16.mxu1 %v5695_v54  ;;  %v5776_v54 = vld [vmem:[#allocation7 + $0x514] ss:$28 sps:$4 sm:$0xff]  }
 0x37c   :  { %4080 = vmatpush1.bf16.msra.mxu1 %v5693_v55 }
 0x37d   :  { %4081 = vmatprep.subr.bf16.mxu1 %v5701_v56 }
 0x380   :  { %4082 = vmatpush1.bf16.msra.mxu1 %v5699_v57 }
 0x381   :  { %4083 = vmatprep.subr.bf16.mxu1 %v5707_v58 }
 0x384   :  { %4084 = vmatpush1.bf16.msra.mxu1 %v5705_v59  ;;  %v5771_v59 = vld [vmem:[#allocation7 + $0x508] ss:$28 sps:$4 sm:$0xff]  }
 0x385   :  { %4085 = vmatprep.subr.bf16.mxu1 %v5713_v60  ;;  %v5774_v60 = vld [vmem:[#allocation7 + $0x510] ss:$28 sps:$4 sm:$0xff]  }
 0x388   :  { %4086 = vmatpush1.bf16.msra.mxu1 %v5711_v61 }
 0x389   :  { %4087 = vmatprep.subr.bf16.mxu1 %v5719_v62  ;;  %v5779_v62 = vld [vmem:[#allocation7 + $0x544] ss:$28 sps:$4 sm:$0xff]  }
 0x38c   :  { %4088 = vmatpush1.bf16.msra.mxu1 %v5717_v1 }
 0x38d   :  { %4089 = vmatprep.subr.bf16.mxu1 %v5725_v2  ;;  %v5777_v2 = vld [vmem:[#allocation7 + $0x540] ss:$28 sps:$4 sm:$0xff]  }
 0x390   :  { %4090 = vmatpush1.bf16.msra.mxu1 %v5723_v6  ;;  %v5788_v6 = vld [vmem:[#allocation7 + $0x584] ss:$28 sps:$4 sm:$0xff]  }
 0x391   :  { %4100 = vmatprep.subr.bf16.mxu1 %v5731_v7  ;;  %v5783_v7 = vld [vmem:[#allocation7 + $0x578] ss:$28 sps:$4 sm:$0xff]  }
 0x406   :  { %v2558_v13 = vpop.f32.mrb[4].mxu1 }
 0x407   :  { %v2559_v14 = vadd.f32 %v2558_v13, %v2347_v10  ;;  %v2560_v15 = vpop.f32.mrb[5].mxu1  ;;  %v5791_v10 = vld [vmem:[#allocation7 + $0x5b4] ss:$28 sps:$4 sm:$0xff]  }
 0x408   :  { %v2561_v16 = vadd.f32 %v2560_v15, %v2351_v12  ;;  %v2562_v17 = vpop.f32.mrb[6].mxu1  ;;  %v5794_v12 = vld [vmem:[#allocation7 + $0x5bc] ss:$28 sps:$4 sm:$0xff]   ;;  %v5789_v13 = vld [vmem:[#allocation7 + $0x5b0] ss:$28 sps:$4 sm:$0xff]  }
 0x409   :  { %v2606_v20 = vmax.f32 %v2559_v14, 0.0  ;;  %v2563_v23 = vpop.f32.mrb[7].mxu1  ;;  %v5792_v14 = vld [vmem:[#allocation7 + $0x5b8] ss:$28 sps:$4 sm:$0xff]   ;;  %v5797_v15 = vld [vmem:[#allocation7 + $0x5ec] ss:$28 sps:$4 sm:$0xff]  }
 0x40a   :  { %v2607_v24 = vmax.f32 %v2561_v16, 0.0  ;;  %v5800_v16 = vld [vmem:[#allocation7 + $0x5f4] ss:$28 sps:$4 sm:$0xff]   ;;  %v5795_v17 = vld [vmem:[#allocation7 + $0x5e8] ss:$28 sps:$4 sm:$0xff]  }
 0x40b   :  { %v6286_v28 = vpack.c.bf16 %v2606_v20, %v2606_v20  ;;  %v5798_v20 = vld [vmem:[#allocation7 + $0x5f0] ss:$28 sps:$4 sm:$0xff]   ;;  %v5803_v23 = vld [vmem:[#allocation7 + $0x624] ss:$28 sps:$4 sm:$0xff]  }
 0x40c   :  { %v6284_v25 = vpack.c.bf16 %v2607_v24, %v2607_v24  ;;  %v5806_v24 = vld [vmem:[#allocation7 + $0x62c] ss:$28 sps:$4 sm:$0xff]  }
 0x40e   :  { %4091 = vmatprep.mubr.bf16.mxu1 %v6284_v25  ;;  %4173 = vmatprep.mubr.bf16.mxu0 %v6284_v25 }
 0x40f   :  { %4092 = vmatmul.mubr.bf16.vlgmr.msra.gmra.mrb[12].mxu1 %v6286_v28  ;;  %4174 = vmatmul.mubr.bf16.vlgmr.msra.gmra.mrb[8].mxu0 %v6286_v28 }
 0x410   :  { %4101 = vmatpush1.bf16.msra.mxu1 %v5729_v26  ;;  %4183 = vmatpush1.bf16.msra.mxu0 %v5732_v27  ;;  %v5801_v26 = vld [vmem:[#allocation7 + $0x620] ss:$28 sps:$4 sm:$0xff]   ;;  %v5804_v27 = vld [vmem:[#allocation7 + $0x628] ss:$28 sps:$4 sm:$0xff]  }
 0x411   :  { %4102 = vmatprep.subr.bf16.mxu1 %v5737_v29  ;;  %4184 = vmatprep.subr.bf16.mxu0 %v5740_v30  ;;  %v5809_v29 = vld [vmem:[#allocation7 + $0x65c] ss:$28 sps:$4 sm:$0xff]   ;;  %v5812_v30 = vld [vmem:[#allocation7 + $0x664] ss:$28 sps:$4 sm:$0xff]  }
 0x414   :  { %4103 = vmatpush1.bf16.msra.mxu1 %v5735_v31  ;;  %4185 = vmatpush1.bf16.msra.mxu0 %v5738_v22  ;;  %v5807_v31 = vld [vmem:[#allocation7 + $0x658] ss:$28 sps:$4 sm:$0xff]   ;;  %v5810_v22 = vld [vmem:[#allocation7 + $0x660] ss:$28 sps:$4 sm:$0xff]  }
 0x415   :  { %4104 = vmatprep.subr.bf16.mxu1 %v5743_v32  ;;  %4186 = vmatprep.subr.bf16.mxu0 %v5746_v33  ;;  %v2355_v32 = vrot.slane %v6278_v9, %v6255_v4  ;;  %v5815_v33 = vld [vmem:[#allocation7 + $0x694] ss:$28 sps:$4 sm:$0xff]  }
 0x416   :  { %v5827_v9 = vld [vmem:[#allocation7 + $0x14] ss:$28 sps:$4 sm:$0xff]  }
 0x418   :  { %4105 = vmatpush1.bf16.msra.mxu1 %v5741_v34  ;;  %4187 = vmatpush1.bf16.msra.mxu0 %v5744_v35  ;;  %v5818_v34 = vld [vmem:[#allocation7 + $0x69c] ss:$28 sps:$4 sm:$0xff]   ;;  %v5813_v35 = vld [vmem:[#allocation7 + $0x690] ss:$28 sps:$4 sm:$0xff]  }
 0x419   :  { %4106 = vmatprep.subr.bf16.mxu1 %v5749_v36  ;;  %4188 = vmatprep.subr.bf16.mxu0 %v5752_v37  ;;  %v5816_v36 = vld [vmem:[#allocation7 + $0x698] ss:$28 sps:$4 sm:$0xff]  }
 0x41c   :  { %4107 = vmatpush1.bf16.msra.mxu1 %v5747_v38  ;;  %4189 = vmatpush1.bf16.msra.mxu0 %v5750_v39  ;;  %v5821_v38 = vld [vmem:[#allocation7 + $0x6cc] ss:$28 sps:$4 sm:$0xff]   ;;  %v5824_v39 = vld [vmem:[#allocation7 + $0x6d4] ss:$28 sps:$4 sm:$0xff]  }
 0x41d   :  { %4108 = vmatprep.subr.bf16.mxu1 %v5755_v40  ;;  %4190 = vmatprep.subr.bf16.mxu0 %v5758_v41  ;;  %v5819_v40 = vld [vmem:[#allocation7 + $0x6c8] ss:$28 sps:$4 sm:$0xff]   ;;  %v5822_v41 = vld [vmem:[#allocation7 + $0x6d0] ss:$28 sps:$4 sm:$0xff]  }
 0x420   :  { %4109 = vmatpush1.bf16.msra.mxu1 %v5753_v42  ;;  %4191 = vmatpush1.bf16.msra.mxu0 %v5756_v43  ;;  %v5828_v43 = vld [vmem:[#allocation7 + $0x1d8] ss:$28 sps:$4 sm:$0xff]  }
 0x421   :  { %4110 = vmatprep.subr.bf16.mxu1 %v5761_v44  ;;  %4192 = vmatprep.subr.bf16.mxu0 %v5764_v45  ;;  %v5825_v44 = vld [vmem:[#allocation7 + $0x10] ss:$28 sps:$4 sm:$0xff]  }
 0x424   :  { %4111 = vmatpush1.bf16.msra.mxu1 %v5759_v46  ;;  %4193 = vmatpush1.bf16.msra.mxu0 %v5762_v47  ;;  %v5829_v46 = vld [vmem:[#allocation7 + $0x18] ss:$28 sps:$4 sm:$0xff]   ;;  %v5832_v47 = vld [vmem:[#allocation7 + $0x4c] ss:$28 sps:$4 sm:$0xff]  }
 0x425   :  { %4112 = vmatprep.subr.bf16.mxu1 %v5767_v48  ;;  %4194 = vmatprep.subr.bf16.mxu0 %v5770_v49  ;;  %v5833_v48 = vld [vmem:[#allocation7 + $0x210] ss:$28 sps:$4 sm:$0xff]   ;;  %v5830_v49 = vld [vmem:[#allocation7 + $0x48] ss:$28 sps:$4 sm:$0xff]  }
 0x426   :  { %v6294_v55 = vpop.f32.mrb[8].mxu1 }
 0x427   :  { %v2601_v56 = vpop.f32.mrb[9].mxu1  ;;  %v2600_v37 = vadd.f32 %v6294_v55, %v2355_v32  ;;  %v5842_v55 = vld [vmem:[#allocation7 + $0xbc] ss:$28 sps:$4 sm:$0xff]  }
 0x428   :  { %v2602_v57 = vadd.f32 %v2601_v56, %v2359_v50  ;;  %v2603_v58 = vpop.f32.mrb[10].mxu1  ;;  %4113 = vmatpush1.bf16.msra.mxu1 %v5765_v51  ;;  %4195 = vmatpush1.bf16.msra.mxu0 %v5768_v52  ;;  %v5834_v50 = vld [vmem:[#allocation7 + $0x50] ss:$28 sps:$4 sm:$0xff]   ;;  %v5837_v51 = vld [vmem:[#allocation7 + $0x84] ss:$28 sps:$4 sm:$0xff]  }
 0x429   :  { %v2604_v61 = vpop.f32.mrb[11].mxu1  ;;  %4114 = vmatprep.subr.bf16.mxu1 %v5773_v53  ;;  %4196 = vmatprep.subr.bf16.mxu0 %v5776_v54  ;;  %v2608_v42 = vmax.f32 %v2600_v37, 0.0  ;;  %v5838_v52 = vld [vmem:[#allocation7 + $0x248] ss:$28 sps:$4 sm:$0xff]   ;;  %v5835_v53 = vld [vmem:[#allocation7 + $0x80] ss:$28 sps:$4 sm:$0xff]  }
 0x42a   :  { %v2609_v0 = vmax.f32 %v2602_v57, 0.0  ;;  %v5839_v54 = vld [vmem:[#allocation7 + $0x88] ss:$28 sps:$4 sm:$0xff]   ;;  %v5843_v56 = vld [vmem:[#allocation7 + $0x280] ss:$28 sps:$4 sm:$0xff]  }
 0x42b   :  { %v6303_v45 = vpack.c.bf16 %v2608_v42, %v2608_v42  ;;  %v5840_v57 = vld [vmem:[#allocation7 + $0xb8] ss:$28 sps:$4 sm:$0xff]   ;;  %v5844_v58 = vld [vmem:[#allocation7 + $0xc0] ss:$28 sps:$4 sm:$0xff]   ;;  %v5885_v37 = vld [vmem:[#allocation7 + $0x2b0] ss:$28 sps:$4 sm:$0xff]  }
 0x42c   :  { %v6296_v1 = vpack.c.bf16 %v2609_v0, %v2609_v0  ;;  %4115 = vmatpush1.bf16.msra.mxu1 %v5771_v59  ;;  %4197 = vmatpush1.bf16.msra.mxu0 %v5774_v60  ;;  %v5847_v59 = vld [vmem:[#allocation7 + $0xf4] ss:$28 sps:$4 sm:$0xff]   ;;  %v5850_v0 = vld [vmem:[#allocation7 + $0x128] ss:$28 sps:$4 sm:$0xff]   ;;  %v5883_v32 = vld [vmem:[#allocation7 + $0x600] ss:$28 sps:$4 sm:$0xff]  }
 0x42d   :  { %4116 = vmatprep.subr.bf16.mxu1 %v5779_v62  ;;  %4198 = vmatprep.subr.bf16.mxu0 %v5782_v63  ;;  %v5845_v60 = vld [vmem:[#allocation7 + $0xf0] ss:$28 sps:$4 sm:$0xff]   ;;  %v5849_v61 = vld [vmem:[#allocation7 + $0xf8] ss:$28 sps:$4 sm:$0xff]  }
 0x42e   :  { %4132 = vmatprep.mubr.bf16.mxu1 %v6296_v1  ;;  %4214 = vmatprep.mubr.bf16.mxu0 %v6296_v1  ;;  %v5852_v62 = vld [vmem:[#allocation7 + $0x12c] ss:$28 sps:$4 sm:$0xff]  }
 0x42f   :  { %v5853_v63 = vld [vmem:[#allocation7 + $0x2f0] ss:$28 sps:$4 sm:$0xff]  }
 0x430   :  { %4117 = vmatpush1.bf16.msra.mxu1 %v5777_v2  ;;  %4199 = vmatpush1.bf16.msra.mxu0 %v5780_v3  ;;  %v5854_v2 = vld [vmem:[#allocation7 + $0x130] ss:$28 sps:$4 sm:$0xff]   ;;  %v5857_v3 = vld [vmem:[#allocation7 + $0x164] ss:$28 sps:$4 sm:$0xff]  }
 0x431   :  { %4118 = vmatprep.subr.bf16.mxu1 %v5785_v5  ;;  %4200 = vmatprep.subr.bf16.mxu0 %v5788_v6  ;;  %v5858_v5 = vld [vmem:[#allocation7 + $0x328] ss:$28 sps:$4 sm:$0xff]   ;;  %v5855_v6 = vld [vmem:[#allocation7 + $0x160] ss:$28 sps:$4 sm:$0xff]   ;;  %v5894_v42 = vld [vmem:[#allocation7 + $0x4b0] ss:$28 sps:$4 sm:$0xff]  }
 0x434   :  { %4119 = vmatpush1.bf16.msra.mxu1 %v5783_v7  ;;  %4201 = vmatpush1.bf16.msra.mxu0 %v5786_v8  ;;  %v5859_v7 = vld [vmem:[#allocation7 + $0x168] ss:$28 sps:$4 sm:$0xff]   ;;  %v5862_v8 = vld [vmem:[#allocation7 + $0x19c] ss:$28 sps:$4 sm:$0xff]  }
 0x435   :  { %4120 = vmatprep.subr.bf16.mxu1 %v5791_v10  ;;  %4202 = vmatprep.subr.bf16.mxu0 %v5794_v12  ;;  %v5863_v10 = vld [vmem:[#allocation7 + $0x360] ss:$28 sps:$4 sm:$0xff]   ;;  %v5860_v12 = vld [vmem:[#allocation7 + $0x198] ss:$28 sps:$4 sm:$0xff]  }
 0x438   :  { %4121 = vmatpush1.bf16.msra.mxu1 %v5789_v13  ;;  %4203 = vmatpush1.bf16.msra.mxu0 %v5792_v14  ;;  %v5864_v13 = vld [vmem:[#allocation7 + $0x1a0] ss:$28 sps:$4 sm:$0xff]   ;;  %v5867_v14 = vld [vmem:[#allocation7 + $0x1d4] ss:$28 sps:$4 sm:$0xff]  }
 0x439   :  { %4122 = vmatprep.subr.bf16.mxu1 %v5797_v15  ;;  %4204 = vmatprep.subr.bf16.mxu0 %v5800_v16  ;;  %v5868_v15 = vld [vmem:[#allocation7 + $0x558] ss:$28 sps:$4 sm:$0xff]   ;;  %v5865_v16 = vld [vmem:[#allocation7 + $0x1d0] ss:$28 sps:$4 sm:$0xff]  }
 0x43c   :  { %4123 = vmatpush1.bf16.msra.mxu1 %v5795_v17  ;;  %4205 = vmatpush1.bf16.msra.mxu0 %v5798_v20  ;;  %v5869_v17 = vld [vmem:[#allocation7 + $0x398] ss:$28 sps:$4 sm:$0xff]   ;;  %v5872_v20 = vld [vmem:[#allocation7 + $0x20c] ss:$28 sps:$4 sm:$0xff]  }
 0x43d   :  { %4124 = vmatprep.subr.bf16.mxu1 %v5803_v23  ;;  %4206 = vmatprep.subr.bf16.mxu0 %v5806_v24  ;;  %v5873_v23 = vld [vmem:[#allocation7 + $0x590] ss:$28 sps:$4 sm:$0xff]   ;;  %v5870_v24 = vld [vmem:[#allocation7 + $0x208] ss:$28 sps:$4 sm:$0xff]  }
 0x440   :  { %4125 = vmatpush1.bf16.msra.mxu1 %v5801_v26  ;;  %4207 = vmatpush1.bf16.msra.mxu0 %v5804_v27  ;;  %v5874_v26 = vld [vmem:[#allocation7 + $0x3d0] ss:$28 sps:$4 sm:$0xff]   ;;  %v5877_v27 = vld [vmem:[#allocation7 + $0x244] ss:$28 sps:$4 sm:$0xff]  }
 0x441   :  { %4126 = vmatprep.subr.bf16.mxu1 %v5809_v29  ;;  %4208 = vmatprep.subr.bf16.mxu0 %v5812_v30  ;;  %v5878_v29 = vld [vmem:[#allocation7 + $0x5c8] ss:$28 sps:$4 sm:$0xff]   ;;  %v5875_v30 = vld [vmem:[#allocation7 + $0x240] ss:$28 sps:$4 sm:$0xff]  }
 0x444   :  { %4127 = vmatpush1.bf16.msra.mxu1 %v5807_v31  ;;  %4209 = vmatpush1.bf16.msra.mxu0 %v5810_v22  ;;  %v5879_v31 = vld [vmem:[#allocation7 + $0x408] ss:$28 sps:$4 sm:$0xff]   ;;  %v5882_v22 = vld [vmem:[#allocation7 + $0x27c] ss:$28 sps:$4 sm:$0xff]  }
 0x445   :  { %4128 = vmatprep.subr.bf16.mxu1 %v5815_v33  ;;  %4210 = vmatprep.subr.bf16.mxu0 %v5818_v34  ;;  %v5880_v33 = vld [vmem:[#allocation7 + $0x278] ss:$28 sps:$4 sm:$0xff]   ;;  %v5884_v34 = vld [vmem:[#allocation7 + $0x440] ss:$28 sps:$4 sm:$0xff]  }
 0x448   :  { %4129 = vmatpush1.bf16.msra.mxu1 %v5813_v35  ;;  %4211 = vmatpush1.bf16.msra.mxu0 %v5816_v36  ;;  %v5887_v35 = vld [vmem:[#allocation7 + $0x2b4] ss:$28 sps:$4 sm:$0xff]  }
 0x449   :  { %4130 = vmatprep.subr.bf16.mxu1 %v5821_v38  ;;  %4212 = vmatprep.subr.bf16.mxu0 %v5824_v39  ;;  %v5888_v36 = vld [vmem:[#allocation7 + $0x638] ss:$28 sps:$4 sm:$0xff]   ;;  %v5892_v39 = vld [vmem:[#allocation7 + $0x2ec] ss:$28 sps:$4 sm:$0xff]  }
 0x44a   :  { %v5889_v38 = vld [vmem:[#allocation7 + $0x478] ss:$28 sps:$4 sm:$0xff]  }
 0x44c   :  { %4131 = vmatpush1.bf16.msra.mxu1 %v5819_v40  ;;  %4213 = vmatpush1.bf16.msra.mxu0 %v5822_v41  ;;  %v5893_v40 = vld [vmem:[#allocation7 + $0x670] ss:$28 sps:$4 sm:$0xff]   ;;  %v5890_v41 = vld [vmem:[#allocation7 + $0x2e8] ss:$28 sps:$4 sm:$0xff]  }
 0x44d   :  { %4223 = vmatprep.subr.bf16.mxu1 %v5827_v9  ;;  %5039 = vmatprep.subr.bf16.mxu0 %v5828_v43  ;;  %v5897_v9 = vld [vmem:[#allocation7 + $0x324] ss:$28 sps:$4 sm:$0xff]  }
 0x44e   :  { %v5898_v43 = vld [vmem:[#allocation7 + $0x6a8] ss:$28 sps:$4 sm:$0xff]  }
 0x44f   :  { %4133 = vmatmul.mubr.bf16.vlgmr.msra.gmra.mrb[12].mxu1 %v6303_v45  ;;  %4215 = vmatmul.mubr.bf16.vlgmr.msra.gmra.mrb[8].mxu0 %v6303_v45 }
 0x450   :  { %4224 = vmatpush1.bf16.msra.mxu1 %v5825_v44  ;;  %4255 = vmatprep.mubr.bf16.mxu1 %v6284_v25  ;;  %v5895_v44 = vld [vmem:[#allocation7 + $0x320] ss:$28 sps:$4 sm:$0xff]  }
 0x451   :  { %5040 = vmatpush3.bf16.msra.mxu0 %v5829_v46  ;;  %4337 = vmatprep.mubr.bf16.mxu0 %v6284_v25  ;;  %v5848_v25 = vld [vmem:[#allocation7 + $0x2b8] ss:$28 sps:$4 sm:$0xff]   ;;  %v5899_v46 = vld [vmem:[#allocation7 + $0x4e8] ss:$28 sps:$4 sm:$0xff]  }
 0x452   :  { %4225 = vmatprep.subr.bf16.mxu1 %v5832_v47  ;;  %5041 = vmatprep.subr.bf16.mxu0 %v5833_v48  ;;  %v5902_v47 = vld [vmem:[#allocation7 + $0x35c] ss:$28 sps:$4 sm:$0xff]  }
 0x453   :  { %v5903_v48 = vld [vmem:[#allocation7 + $0x6e0] ss:$28 sps:$4 sm:$0xff]  }
 0x454   :  { %4226 = vmatpush1.bf16.msra.mxu1 %v5830_v49  ;;  %v5900_v49 = vld [vmem:[#allocation7 + $0x358] ss:$28 sps:$4 sm:$0xff]  }
 0x455   :  { %5042 = vmatpush3.bf16.msra.mxu0 %v5834_v50  ;;  %4227 = vmatprep.subr.bf16.mxu1 %v5837_v51  ;;  %v5904_v50 = vld [vmem:[#allocation7 + $0x520] ss:$28 sps:$4 sm:$0xff]   ;;  %v5907_v51 = vld [vmem:[#allocation7 + $0x394] ss:$28 sps:$4 sm:$0xff]  }
 0x456   :  { %5043 = vmatprep.subr.bf16.mxu0 %v5838_v52  ;;  %v5905_v52 = vld [vmem:[#allocation7 + $0x390] ss:$28 sps:$4 sm:$0xff]  }
 0x458   :  { %4228 = vmatpush1.bf16.msra.mxu1 %v5835_v53  ;;  %v5910_v53 = vld [vmem:[#allocation7 + $0x3cc] ss:$28 sps:$4 sm:$0xff]  }
 0x459   :  { %5044 = vmatpush3.bf16.msra.mxu0 %v5839_v54  ;;  %4229 = vmatprep.subr.bf16.mxu1 %v5842_v55  ;;  %v5908_v54 = vld [vmem:[#allocation7 + $0x3c8] ss:$28 sps:$4 sm:$0xff]  }
 0x45a   :  { %5045 = vmatprep.subr.bf16.mxu0 %v5843_v56  ;;  %v5913_v55 = vld [vmem:[#allocation7 + $0x404] ss:$28 sps:$4 sm:$0xff]  }
 0x45b   :  { %v5911_v56 = vld [vmem:[#allocation7 + $0x400] ss:$28 sps:$4 sm:$0xff]  }
 0x45c   :  { %4230 = vmatpush1.bf16.msra.mxu1 %v5840_v57  ;;  %v5916_v57 = vld [vmem:[#allocation7 + $0x43c] ss:$28 sps:$4 sm:$0xff]  }
 0x45d   :  { %5046 = vmatpush3.bf16.msra.mxu0 %v5844_v58  ;;  %4231 = vmatprep.subr.bf16.mxu1 %v5847_v59  ;;  %v5914_v58 = vld [vmem:[#allocation7 + $0x438] ss:$28 sps:$4 sm:$0xff]  }
 0x45e   :  { %5047 = vmatprep.subr.bf16.mxu0 %v5848_v25  ;;  %v5919_v59 = vld [vmem:[#allocation7 + $0x474] ss:$28 sps:$4 sm:$0xff]  }
 0x45f   :  { %v5917_v25 = vld [vmem:[#allocation7 + $0x470] ss:$28 sps:$4 sm:$0xff]  }
 0x460   :  { %4232 = vmatpush1.bf16.msra.mxu1 %v5845_v60  ;;  %v5920_v60 = vld [vmem:[#allocation7 + $0x4a8] ss:$28 sps:$4 sm:$0xff]  }
 0x461   :  { %5048 = vmatpush3.bf16.msra.mxu0 %v5849_v61  ;;  %4233 = vmatprep.subr.bf16.mxu1 %v5852_v62  ;;  %v5925_v61 = vld [vmem:[#allocation7 + $0x4e4] ss:$28 sps:$4 sm:$0xff]   ;;  %v5928_v62 = vld [vmem:[#allocation7 + $0x51c] ss:$28 sps:$4 sm:$0xff]  }
 0x462   :  { %5049 = vmatprep.subr.bf16.mxu0 %v5853_v63  ;;  %v5926_v63 = vld [vmem:[#allocation7 + $0x518] ss:$28 sps:$4 sm:$0xff]  }
 0x464   :  { %4234 = vmatpush1.bf16.msra.mxu1 %v5850_v0  ;;  %v5931_v0 = vld [vmem:[#allocation7 + $0x554] ss:$28 sps:$4 sm:$0xff]  }
 0x465   :  { %5050 = vmatpush3.bf16.msra.mxu0 %v5854_v2  ;;  %4235 = vmatprep.subr.bf16.mxu1 %v5857_v3  ;;  %v5929_v2 = vld [vmem:[#allocation7 + $0x550] ss:$28 sps:$4 sm:$0xff]  }
 0x466   :  { %5051 = vmatprep.subr.bf16.mxu0 %v5858_v5  ;;  %v5934_v3 = vld [vmem:[#allocation7 + $0x58c] ss:$28 sps:$4 sm:$0xff]  }
 0x467   :  { %v5932_v5 = vld [vmem:[#allocation7 + $0x588] ss:$28 sps:$4 sm:$0xff]  }
 0x468   :  { %4236 = vmatpush1.bf16.msra.mxu1 %v5855_v6  ;;  %v5937_v6 = vld [vmem:[#allocation7 + $0x5c4] ss:$28 sps:$4 sm:$0xff]  }
 0x469   :  { %5052 = vmatpush3.bf16.msra.mxu0 %v5859_v7  ;;  %4237 = vmatprep.subr.bf16.mxu1 %v5862_v8  ;;  %v5935_v7 = vld [vmem:[#allocation7 + $0x5c0] ss:$28 sps:$4 sm:$0xff]  }
 0x46a   :  { %5053 = vmatprep.subr.bf16.mxu0 %v5863_v10  ;;  %v5940_v8 = vld [vmem:[#allocation7 + $0x5fc] ss:$28 sps:$4 sm:$0xff]  }
 0x46b   :  { %v5938_v10 = vld [vmem:[#allocation7 + $0x5f8] ss:$28 sps:$4 sm:$0xff]  }
 0x46c   :  { %4238 = vmatpush1.bf16.msra.mxu1 %v5860_v12  ;;  %v5943_v12 = vld [vmem:[#allocation7 + $0x634] ss:$28 sps:$4 sm:$0xff]  }
 0x46d   :  { %5054 = vmatpush3.bf16.msra.mxu0 %v5864_v13  ;;  %4239 = vmatprep.subr.bf16.mxu1 %v5867_v14  ;;  %v5941_v13 = vld [vmem:[#allocation7 + $0x630] ss:$28 sps:$4 sm:$0xff]  }
 0x46e   :  { %5061 = vmatprep.subr.bf16.mxu0 %v5868_v15  ;;  %v5946_v14 = vld [vmem:[#allocation7 + $0x66c] ss:$28 sps:$4 sm:$0xff]  }
 0x46f   :  { %v5944_v15 = vld [vmem:[#allocation7 + $0x668] ss:$28 sps:$4 sm:$0xff]  }
 0x470   :  { %4338 = vmatmul.mubr.bf16.vlgmr.msra.gmra.mrb[12].mxu0 %v6286_v28  ;;  %4240 = vmatpush1.bf16.msra.mxu1 %v5865_v16  ;;  %v5949_v16 = vld [vmem:[#allocation7 + $0x6a4] ss:$28 sps:$4 sm:$0xff]  }
 0x471   :  { %5062 = vmatpush3.bf16.msra.mxu0 %v5869_v17  ;;  %4377 = vmatprep.mubr.bf16.mxu0 %v6296_v1  ;;  %v5947_v17 = vld [vmem:[#allocation7 + $0x6a0] ss:$28 sps:$4 sm:$0xff]  }
 0x472   :  { %4241 = vmatprep.subr.bf16.mxu1 %v5872_v20  ;;  %5063 = vmatprep.subr.bf16.mxu0 %v5873_v23  ;;  %v5952_v20 = vld [vmem:[#allocation7 + $0x6dc] ss:$28 sps:$4 sm:$0xff]  }
 0x473   :  { %v5950_v23 = vld [vmem:[#allocation7 + $0x6d8] ss:$28 sps:$4 sm:$0xff]  }
 0x474   :  { %4242 = vmatpush1.bf16.msra.mxu1 %v5870_v24  ;;  %v6318_v24 = vld [vmem:[%s6354_s8] sm:$0xff] }
 0x475   :  { %5064 = vmatpush3.bf16.msra.mxu0 %v5874_v26  ;;  %4243 = vmatprep.subr.bf16.mxu1 %v5877_v27  ;;  %v2875_v26 = vrot.slane %v6318_v24, %v6233_v19  ;;  %v2883_v27 = vrot.slane %v6318_v24, %v6255_v4 }
 0x476   :  { %5065 = vmatprep.subr.bf16.mxu0 %v5878_v29  ;;  %v2879_v29 = vrot.slane %v6318_v24, %v6241_v21 }
 0x478   :  { %4244 = vmatpush1.bf16.msra.mxu1 %v5875_v30  ;;  %v2887_v30 = vrot.slane %v6318_v24, %v6244_v11 }
 0x479   :  { %5066 = vmatpush3.bf16.msra.mxu0 %v5879_v31  ;;  %4245 = vmatprep.subr.bf16.mxu1 %v5882_v22 }
 0x47a   :  { %5067 = vmatprep.subr.bf16.mxu0 %v5883_v32 }
 0x47c   :  { %4246 = vmatpush1.bf16.msra.mxu1 %v5880_v33 }
 0x47d   :  { %5068 = vmatpush3.bf16.msra.mxu0 %v5884_v34  ;;  %4247 = vmatprep.subr.bf16.mxu1 %v5887_v35 }
 0x47e   :  { %5069 = vmatprep.subr.bf16.mxu0 %v5888_v36 }
 0x480   :  { %4248 = vmatpush1.bf16.msra.mxu1 %v5885_v37 }
 0x481   :  { %5070 = vmatpush3.bf16.msra.mxu0 %v5889_v38  ;;  %4249 = vmatprep.subr.bf16.mxu1 %v5892_v39 }
 0x482   :  { %5071 = vmatprep.subr.bf16.mxu0 %v5893_v40 }
 0x484   :  { %4250 = vmatpush1.bf16.msra.mxu1 %v5890_v41 }
 0x485   :  { %5072 = vmatpush3.bf16.msra.mxu0 %v5894_v42  ;;  %4251 = vmatprep.subr.bf16.mxu1 %v5897_v9 }
 0x486   :  { %5073 = vmatprep.subr.bf16.mxu0 %v5898_v43 }
 0x488   :  { %4252 = vmatpush1.bf16.msra.mxu1 %v5895_v44 }
 0x489   :  { %5074 = vmatpush3.bf16.msra.mxu0 %v5899_v46  ;;  %4253 = vmatprep.subr.bf16.mxu1 %v5902_v47 }
 0x48a   :  { %5075 = vmatprep.subr.bf16.mxu0 %v5903_v48 }
 0x48c   :  { %4254 = vmatpush1.bf16.msra.mxu1 %v5900_v49 }
 0x48d   :  { %5076 = vmatpush3.bf16.msra.mxu0 %v5904_v50  ;;  %4264 = vmatprep.subr.bf16.mxu1 %v5907_v51 }
 0x48f   :  { %4256 = vmatmul.mubr.bf16.vlgmr.msra.gmra.mrb[16].mxu1 %v6286_v28  ;;  %v5922_v28 = vld [vmem:[#allocation7 + $0x4ac] ss:$28 sps:$4 sm:$0xff]  }
 0x490   :  { %4378 = vmatmul.mubr.bf16.vlgmr.msra.gmra.mrb[16].mxu0 %v6303_v45  ;;  %4265 = vmatpush1.bf16.msra.mxu1 %v5905_v52 }
 0x491   :  { %4296 = vmatprep.mubr.bf16.mxu1 %v6296_v1  ;;  %4266 = vmatprep.subr.bf16.mxu1 %v5910_v53  ;;  %v5923_v1 = vld [vmem:[#allocation7 + $0x4e0] ss:$28 sps:$4 sm:$0xff]  }
 0x494   :  { %4267 = vmatpush1.bf16.msra.mxu1 %v5908_v54 }
 0x495   :  { %4268 = vmatprep.subr.bf16.mxu1 %v5913_v55 }
 0x498   :  { %4269 = vmatpush1.bf16.msra.mxu1 %v5911_v56 }
 0x499   :  { %4270 = vmatprep.subr.bf16.mxu1 %v5916_v57 }
 0x49c   :  { %4271 = vmatpush1.bf16.msra.mxu1 %v5914_v58 }
 0x49d   :  { %4272 = vmatprep.subr.bf16.mxu1 %v5919_v59 }
 0x4a0   :  { %4273 = vmatpush1.bf16.msra.mxu1 %v5917_v25  ;;  %v2898_v25 = vsub.s32 6, %v6230_v18 }
 0x4a1   :  { %4274 = vmatprep.subr.bf16.mxu1 %v5922_v28 }
 0x4a2   :  { %v2899_v28 = vrot.slane %v6318_v24, %v2898_v25 }
 0x4a4   :  { %4275 = vmatpush1.bf16.msra.mxu1 %v5920_v60 }
 0x4a5   :  { %4276 = vmatprep.subr.bf16.mxu1 %v5925_v61 }
 0x4a8   :  { %4277 = vmatpush1.bf16.msra.mxu1 %v5923_v1 }
 0x4a9   :  { %4278 = vmatprep.subr.bf16.mxu1 %v5928_v62 }
 0x4ac   :  { %4279 = vmatpush1.bf16.msra.mxu1 %v5926_v63 }
 0x4ad   :  { %4280 = vmatprep.subr.bf16.mxu1 %v5931_v0 }
 0x4b0   :  { %4281 = vmatpush1.bf16.msra.mxu1 %v5929_v2 }
 0x4b1   :  { %4282 = vmatprep.subr.bf16.mxu1 %v5934_v3 }
 0x4b4   :  { %4283 = vmatpush1.bf16.msra.mxu1 %v5932_v5 }
 0x4b5   :  { %4284 = vmatprep.subr.bf16.mxu1 %v5937_v6 }
 0x4b8   :  { %4285 = vmatpush1.bf16.msra.mxu1 %v5935_v7 }
 0x4b9   :  { %4286 = vmatprep.subr.bf16.mxu1 %v5940_v8 }
 0x4bc   :  { %4287 = vmatpush1.bf16.msra.mxu1 %v5938_v10  ;;  %v2890_v10 = vsub.s32 4, %v6230_v18 }
 0x4bd   :  { %4288 = vmatprep.subr.bf16.mxu1 %v5943_v12  ;;  %v2894_v12 = vsub.s32 5, %v6230_v18 }
 0x4c0   :  { %4289 = vmatpush1.bf16.msra.mxu1 %v5941_v13  ;;  %v2891_v13 = vrot.slane %v6318_v24, %v2890_v10 }
 0x4c1   :  { %4290 = vmatprep.subr.bf16.mxu1 %v5946_v14  ;;  %v2895_v14 = vrot.slane %v6318_v24, %v2894_v12 }
 0x4c4   :  { %4291 = vmatpush1.bf16.msra.mxu1 %v5944_v15 }
 0x4c5   :  { %4292 = vmatprep.subr.bf16.mxu1 %v5949_v16 }
 0x4c8   :  { %4293 = vmatpush1.bf16.msra.mxu1 %v5947_v17 }
 0x4c9   :  { %4294 = vmatprep.subr.bf16.mxu1 %v5952_v20 }
 0x4cc   :  { %4295 = vmatpush1.bf16.msra.mxu1 %v5950_v23 }
 0x4cf   :  { %4297 = vmatmul.mubr.bf16.vlgmr.msra.gmra.mrb[16].mxu1 %v6303_v45 }
 0x522   :  { %v4134_v31 = vpop.f32.mrb[12].mxu1  ;;  %v4216_v22 = vpop.f32.mrb[8].mxu0 }
 0x523   :  { %v5089_v45 = vadd.f32 %v4134_v31, %v2875_v26  ;;  %v5091_v32 = vadd.f32 %v4216_v22, %v2883_v27  ;;  %v4136_v33 = vpop.f32.mrb[13].mxu1  ;;  %v4218_v34 = vpop.f32.mrb[9].mxu0 }
 0x524   :  { %v5090_v35 = vadd.f32 %v4136_v33, %v2879_v29  ;;  %v5092_v36 = vadd.f32 %v4218_v34, %v2887_v30  ;;  %v4138_v37 = vpop.f32.mrb[14].mxu1  ;;  %v4220_v38 = vpop.f32.mrb[10].mxu0 }
 0x525   :  { %v5024_v19 = vmul.f32 -1.442695, %v5089_v45  ;;  %v5026_v39 = vmul.f32 -1.442695, %v5091_v32  ;;  %v4139_v40 = vpop.f32.mrb[15].mxu1  ;;  %v4221_v4 = vpop.f32.mrb[11].mxu0 }
 0x526   :  { %v5025_v41 = vmul.f32 -1.442695, %v5090_v35  ;;  %v5027_v42 = vmul.f32 -1.442695, %v5092_v36 }
 0x527   :  { %5955 = vpow2.f32 %v5024_v19 }
 0x528   :  { %5957 = vpow2.f32 %v5026_v39 }
 0x529   :  { %5959 = vpow2.f32 %v5025_v41 }
 0x52a   :  { %5961 = vpow2.f32 %v5027_v42 }
 0x531   :  { %v5956_v21 = vpop.eup %5955 }
 0x532   :  { %v5958_v11 = vpop.eup %5957  ;;  %v4406_v9 = vadd.f32 1.0, %v5956_v21 }
 0x533   :  { %v5960_v43 = vpop.eup %5959  ;;  %v4408_v44 = vadd.f32 1.0, %v5958_v11 }
 0x534   :  { %v5962_v46 = vpop.eup %5961  ;;  %5963 = vrcp.f32 %v4406_v9  ;;  %v4407_v47 = vadd.f32 1.0, %v5960_v43 }
 0x535   :  { %5965 = vrcp.f32 %v4408_v44  ;;  %v4409_v48 = vadd.f32 1.0, %v5962_v46 }
 0x536   :  { %5967 = vrcp.f32 %v4407_v47 }
 0x537   :  { %5969 = vrcp.f32 %v4409_v48 }
 0x53e   :  { %v5964_v49 = vpop.eup %5963 }
 0x53f   :  { %v5966_v50 = vpop.eup %5965 }
 0x540   :  { %v5968_v51 = vpop.eup %5967 }
 0x541   :  { %v5970_v52 = vpop.eup %5969  ;;  %v5035_v53 = vpack.c.bf16 %v5968_v51, %v5964_v49 }
 0x542   :  { %v5036_v54 = vpack.c.bf16 %v5970_v52, %v5966_v50 }
 0x543   :  { %4456 = vst [vmem:[%s6356_s10] sm:$0xff] %v5035_v53  ;;  %v5055_v55 = vpop.f32.mrb[12].mxu0 }
 0x544   :  { %4457 = vst [vmem:[%s6356_s10 + $0x8] sm:$0xff] %v5036_v54  ;;  %v5056_v56 = vpop.f32.mrb[13].mxu0 }
 0x545   :  { %v5057_v57 = vadd.f32 %v5056_v56, %v5055_v55  ;;  %v5058_v58 = vpop.f32.mrb[14].mxu0 }
 0x546   :  { %v5059_v59 = vpop.f32.mrb[15].mxu0 }
 0x547   :  { %v4340_v1 = vadd.f32 %v5057_v57, %v2899_v28 }
 0x563   :  { %v5077_v60 = vpop.f32.mrb[16].mxu0 }
 0x564   :  { %v5078_v61 = vpop.f32.mrb[17].mxu0 }
 0x565   :  { %v5079_v62 = vadd.f32 %v5078_v61, %v5077_v60  ;;  %v5080_v63 = vpop.f32.mrb[18].mxu0 }
 0x566   :  { %v5081_v0 = vpop.f32.mrb[19].mxu0 }
 0x567   :  { %v4380_v2 = vadd.f32 %v5079_v62, %v4340_v1 }
 0x569   :  { %v5030_v3 = vmul.f32 -1.442695, %v4380_v2 }
 0x56b   :  { %5971 = vpow2.f32 %v5030_v3 }
 0x575   :  { %v5972_v5 = vpop.eup %5971 }
 0x576   :  { %v4412_v6 = vadd.f32 1.0, %v5972_v5 }
 0x578   :  { %5973 = vrcp.f32 %v4412_v6 }
 0x582   :  { %v5974_v7 = vpop.eup %5973 }
 0x583   :  { %v5038_v8 = vpack.c.bf16 %v5974_v7, %v5974_v7 }
 0x585   :  { %4459 = vst [vmem:[%s6356_s10 + $0x18] sm:$0xf] %v5038_v8 }
 0x5a2   :  { %v4298_v15 = vpop.f32.mrb[16].mxu1 }
 0x5a3   :  { %v5093_v16 = vadd.f32 %v4298_v15, %v2891_v13  ;;  %v4300_v17 = vpop.f32.mrb[17].mxu1 }
 0x5a4   :  { %v5094_v20 = vadd.f32 %v4300_v17, %v2895_v14  ;;  %v4302_v23 = vpop.f32.mrb[18].mxu1 }
 0x5a5   :  { %v5028_v26 = vmul.f32 -1.442695, %v5093_v16  ;;  %v4303_v27 = vpop.f32.mrb[19].mxu1 }
 0x5a6   :  { %v5029_v29 = vmul.f32 -1.442695, %v5094_v20 }
 0x5a7   :  { %5975 = vpow2.f32 %v5028_v26 }
 0x5a8   :  { %5977 = vpow2.f32 %v5029_v29 }
 0x5b1   :  { %v5976_v30 = vpop.eup %5975 }
 0x5b2   :  { %v5978_v31 = vpop.eup %5977  ;;  %v4410_v22 = vadd.f32 1.0, %v5976_v30 }
 0x5b3   :  { %v4411_v45 = vadd.f32 1.0, %v5978_v31 }
 0x5b4   :  { %5979 = vrcp.f32 %v4410_v22 }
 0x5b5   :  { %5981 = vrcp.f32 %v4411_v45 }
 0x5be   :  { %v5980_v18 = vpop.eup %5979 }
 0x5bf   :  { %v5982_v32 = vpop.eup %5981 }
 0x5c0   :  { %v5037_v33 = vpack.c.bf16 %v5982_v32, %v5980_v18 }
 0x5c2   :  { %4458 = vst [vmem:[%s6356_s10 + $0x10] sm:$0xff] %v5037_v33 }
 0x5c3   :  { %4470 = vsyncpa [#allocation3], 1 }
 0x5c4   :  { %4471 = vsyncpa [#allocation5], 1 }
 0x5c5   :  { %4472 = vsyncpa [#allocation8], 1 }

</bundles_post_ra>
